<compile_context>
chip_gen: v7x
topology: tpu7x:2x2x1
jax: 0.10.0
libtpu: 0.0.40
codegen_flags: <defaults>
</compile_context>

<pallas_src>
import functools
import math

import jax
import jax.numpy as jnp
from jax.experimental import pallas as pl
from jax.experimental.pallas import tpu as pltpu


def _round_up(x, m):
    return ((x + m - 1) // m) * m


def _lcm(a, b):
    return a * b // math.gcd(a, b)


def _conv2d_kernel(x_ref, w_ref, b_ref, o_ref, slab_ref, *,
                   TH, Wout, KH, KW, Cpad, n_h, activation):
    """One (batch, output-row tile, filter tile) per grid step, CHW layout.

    x_ref:    (Cpad, Hp_pad, Wp)  padded input image, resident per batch element
    w_ref:    (TILE_F, Kpad)      weight tile, lane-dense, (kh, kw, c) ordering
    b_ref:    (TILE_F, 1)         f32 bias column
    o_ref:    (TILE_F, TH*Wout)   output tile, pixels flattened onto lanes
    slab_ref: (Kpad, TH*Wout)     persistent im2col VMEM scratch
    """
    P = TH * Wout

    # Build the im2col slab once per (batch, row-tile); reuse it for every
    # filter tile (innermost "arbitrary" axis) since the scratch persists.
    @pl.when(pl.program_id(2) == 0)
    def _build_slab():
        if n_h == 1:
            row_start = 0
        else:
            row_start = pl.multiple_of(pl.program_id(1) * TH, TH)
        for kh in range(KH):
            for kw in range(KW):
                t = x_ref[:, pl.ds(row_start + kh, TH), pl.ds(kw, Wout)]
                # (Cpad, TH, Wout) -> (Cpad, TH*Wout); the destination rows are
                # a sublane-aligned block because Cpad is padded to 8/16.
                slab_ref[pl.ds((kh * KW + kw) * Cpad, Cpad), :] = (
                    t.reshape(Cpad, P))

    # Single MXU contraction over K = KH*KW*Cpad, f32 accumulation.
    acc = jnp.dot(w_ref[...], slab_ref[...], preferred_element_type=jnp.float32)
    acc = acc + b_ref[...]                    # (TILE_F, 1) broadcast over lanes
    if activation is not None:
        acc = activation(acc)                 # fused epilogue, f32
    o_ref[...] = acc.astype(o_ref.dtype)


def _pick_vmem_limit():
    cap = 64 * 1024 * 1024                    # safe default (v7x physical VMEM)
    try:                                      # v5e/v6e: 128 MiB, v7x: 64 MiB
        cap = int(pltpu.get_tpu_info().vmem_capacity_bytes)
    except Exception:
        pass
    return int(min(cap * 3 // 4, 100 * 1024 * 1024))


def conv2d(x_nchw, weight, bias, *, padding=None, activation=None):
    """Conv2D forward: stride (1,1), dilation (1,1), bias, optional activation.

    x_nchw: (N, C, H, W)   weight: (F, C, KH, KW)   bias: (F,)
    returns: (N, F, Hout, Wout)
    """
    N, C, Hin, Win = x_nchw.shape
    F, Cw, KH, KW = weight.shape
    assert Cw == C
    # TODO(synk): stride != (1,1) / dilation != (1,1) not implemented (module defaults).

    if padding is None or padding == "same":
        ph, pw = (KH - 1) // 2, (KW - 1) // 2
    elif padding == "none":
        ph, pw = 0, 0
    elif isinstance(padding, int):
        ph, pw = padding, padding
    else:
        ph, pw = padding

    Hp, Wp = Hin + 2 * ph, Win + 2 * pw
    Hout, Wout = Hp - KH + 1, Wp - KW + 1      # stride 1, dilation 1 (PyTorch formula)
    assert Hout > 0 and Wout > 0

    dtype = x_nchw.dtype
    item = dtype.itemsize
    sub = max(8, 32 // item)                   # sublane packing: 8 f32, 16 bf16

    # Sublane-align the contraction dim (aligned slab writes / MXU K dim).
    Cpad = _round_up(C, sub)
    Kpad = KH * KW * Cpad

    # Filter tiling (innermost grid axis): 256 matches v6e/v7x MXU output width,
    # 128 is v5e-native; small filter counts use a single tile.
    F_pad = _round_up(F, sub)
    if F_pad % 256 == 0:
        TILE_F = 256
    elif F_pad % 128 == 0:
        TILE_F = 128
    else:
        TILE_F = F_pad
    n_f = F_pad // TILE_F

    vmem_limit = _pick_vmem_limit()

    # Output-row tile: multiple of the sublane packing (aligned row slices) and,
    # when it does not blow up tiny images, of 128/gcd(Wout,128) so TH*Wout is a
    # multiple of 128 (unmasked lane-dense stores). Sized against the real
    # per-step consumers: slab + double-buffered output + f32 accumulator.
    lane_need = 128 // math.gcd(Wout, 128)
    th_align = _lcm(sub, lane_need)
    if th_align > 2 * _round_up(Hout, sub):
        th_align = sub
    bytes_per_row = Wout * (Kpad * item + 2 * TILE_F * item + 4 * TILE_F)
    budget = max(vmem_limit // 4, th_align * bytes_per_row)
    th_cap = max(th_align, (budget // bytes_per_row) // th_align * th_align)
    TH = min(_round_up(Hout, th_align), th_cap)
    Hout_pad = _round_up(Hout, TH)
    n_h = Hout_pad // TH
    P = TH * Wout

    # Wrapper pre-passes: channel zero-pad, spatial conv padding, and extra
    # bottom rows so Hout_pad % TH == 0. No layout transpose: kernel/output are
    # CHW / NCHW native.
    x = jnp.pad(x_nchw, ((0, 0), (0, Cpad - C),
                         (ph, ph + (Hout_pad - Hout)), (pw, pw)))
    Hp_pad = Hout_pad + KH - 1

    # Lane-dense 2-D weights matching the slab's (kh, kw, c) ordering, cast to
    # the input dtype (bf16 halves weight/slab bytes, doubles MXU rate); f32 bias.
    w_p = jnp.pad(weight, ((0, F_pad - F), (0, Cpad - C), (0, 0), (0, 0)))
    w2d = jnp.transpose(w_p, (0, 2, 3, 1)).reshape(F_pad, Kpad).astype(dtype)
    b2d = jnp.pad(bias.astype(jnp.float32), (0, F_pad - F)).reshape(F_pad, 1)

    kern = functools.partial(
        _conv2d_kernel, TH=TH, Wout=Wout, KH=KH, KW=KW, Cpad=Cpad, n_h=n_h,
        activation=activation)

    out_flat = pl.pallas_call(
        kern,
        out_shape=jax.ShapeDtypeStruct((N, F_pad, Hout_pad * Wout), dtype),
        grid=(N, n_h, n_f),
        in_specs=[
            # Whole padded image per batch element; block index constant over the
            # row-tile and filter-tile axes so it is DMA'd once per batch element
            # and stays resident.
            pl.BlockSpec((None, Cpad, Hp_pad, Wp), lambda n, i, f: (n, 0, 0, 0)),
            pl.BlockSpec((TILE_F, Kpad), lambda n, i, f: (f, 0)),
            pl.BlockSpec((TILE_F, 1), lambda n, i, f: (f, 0)),
        ],
        out_specs=pl.BlockSpec((None, TILE_F, P), lambda n, i, f: (n, f, i)),
        scratch_shapes=[pltpu.VMEM((Kpad, P), dtype)],
        compiler_params=pltpu.CompilerParams(
            dimension_semantics=("parallel", "parallel", "arbitrary"),
            vmem_limit_bytes=vmem_limit,
        ),
    )(x, w2d, b2d)

    # Free reshape: (N, F_pad, Hout_pad*Wout) is exactly NCHW memory layout;
    # then slice off the filter/row padding (no-ops when nothing was padded).
    out = out_flat.reshape(N, F_pad, Hout_pad, Wout)
    return out[:, :F, :Hout, :]


def orthogonal_init(key, shape):
    """Deterministic orthogonal init (same recipe as torch.nn.init.orthogonal_)."""
    rows = shape[0]
    cols = math.prod(shape[1:])
    flat = jax.random.normal(key, (rows, cols), dtype=jnp.float32)
    if rows < cols:
        flat = flat.T
    q, r = jnp.linalg.qr(flat)
    q = q * jnp.sign(jnp.diag(r))[None, :]
    if rows < cols:
        q = q.T
    return q.reshape(shape)


if __name__ == "__main__":
    key = jax.random.PRNGKey(0)
    k_x, k_w, k_b = jax.random.split(key, 3)

    # Small shapes consistent with the module's forward (NCHW input).
    N, C, H, W = 2, 4, 16, 16
    filters = 8
    kernel_size = (3, 3)

    x = jax.random.normal(k_x, (N, C, H, W), dtype=jnp.float32)
    weight = orthogonal_init(k_w, (filters, C, kernel_size[0], kernel_size[1]))
    fan_in = C * kernel_size[0] * kernel_size[1]
    bound = 1.0 / math.sqrt(fan_in)
    bias = jax.random.uniform(k_b, (filters,), minval=-bound, maxval=bound,
                              dtype=jnp.float32)

    out = conv2d(x, weight, bias, padding="same", activation=None)
    out = jax.block_until_ready(out)
    assert out.shape == (N, filters, H, W)

    # Cross-check against XLA's reference convolution.
    ref = jax.lax.conv_general_dilated(
        x, weight, window_strides=(1, 1),
        padding=((1, 1), (1, 1)),
        dimension_numbers=("NCHW", "OIHW", "NCHW"),
    ) + bias[None, :, None, None]
    assert jnp.allclose(out, ref, rtol=1e-4, atol=1e-4)

    # Fused activation epilogue check (module supports an optional activation).
    out_relu = jax.block_until_ready(conv2d(x, weight, bias, activation=jax.nn.relu))
    assert jnp.allclose(out_relu, jnp.maximum(ref, 0.0), rtol=1e-4, atol=1e-4)

    print("KERNEL_OK")
</pallas_src>

<mosaic_0001>
module attributes {stable_mosaic.version = 11 : i64} {
  func.func @_conv2d_kernel(%arg0: i32, %arg1: i32, %arg2: i32, %arg3: memref<1x8x18x18xf32, #tpu.memory_space<vmem>>, %arg4: memref<8x72xf32, #tpu.memory_space<vmem>>, %arg5: memref<8x1xf32, #tpu.memory_space<vmem>>, %arg6: memref<1x8x256xf32, #tpu.memory_space<vmem>>, %arg7: memref<72x256xf32, #tpu.memory_space<vmem>>) attributes {dimension_semantics = [#tpu.dimension_semantics<parallel>, #tpu.dimension_semantics<parallel>, #tpu.dimension_semantics<arbitrary>], iteration_bounds = array<i64: 2, 1, 1>, scalar_prefetch = 0 : i64, scratch_operands = 1 : i64, tpu.core_type = #tpu.core_type<tc>, window_params = [{transform_indices = @transform_0, window_bounds = array<i64: 1, 8, 18, 18>}, {transform_indices = @transform_1, window_bounds = array<i64: 8, 72>}, {transform_indices = @transform_2, window_bounds = array<i64: 8, 1>}, {transform_indices = @transform_3, window_bounds = array<i64: 1, 8, 256>}]} {
    %c0_i32 = arith.constant 0 : i32
    %0 = arith.cmpi eq, %arg2, %c0_i32 : i32
    %1 = arith.extui %0 : i1 to i32
    %c0_i32_0 = arith.constant 0 : i32
    %2 = arith.cmpi ne, %1, %c0_i32_0 : i32
    scf.if %2 {
      %c0_9 = arith.constant 0 : index
      %c0_10 = arith.constant 0 : index
      %c0_11 = arith.constant 0 : index
      %c0_12 = arith.constant 0 : index
      %12 = vector.load %arg3[%c0_9, %c0_10, %c0_11, %c0_12] : memref<1x8x18x18xf32, #tpu.memory_space<vmem>>, vector<1x8x16x16xf32>
      %13 = vector.shape_cast %12 : vector<1x8x16x16xf32> to vector<8x16x16xf32>
      %14 = vector.shape_cast %13 : vector<8x16x16xf32> to vector<8x256xf32>
      %c0_13 = arith.constant 0 : index
      %c0_14 = arith.constant 0 : index
      %15 = vector.load %arg7[%c0_13, %c0_14] : memref<72x256xf32, #tpu.memory_space<vmem>>, vector<8x256xf32>
      tpu.vector_store %arg7[%c0_13, %c0_14], %14 {strides = array<i32>} : memref<72x256xf32, #tpu.memory_space<vmem>>, vector<8x256xf32>,
      %c0_15 = arith.constant 0 : index
      %c0_16 = arith.constant 0 : index
      %c0_17 = arith.constant 0 : index
      %c1 = arith.constant 1 : index
      %16 = vector.load %arg3[%c0_15, %c0_16, %c0_17, %c1] : memref<1x8x18x18xf32, #tpu.memory_space<vmem>>, vector<1x8x16x16xf32>
      %17 = vector.shape_cast %16 : vector<1x8x16x16xf32> to vector<8x16x16xf32>
      %18 = vector.shape_cast %17 : vector<8x16x16xf32> to vector<8x256xf32>
      %c8 = arith.constant 8 : index
      %c0_18 = arith.constant 0 : index
      %19 = vector.load %arg7[%c8, %c0_18] : memref<72x256xf32, #tpu.memory_space<vmem>>, vector<8x256xf32>
      tpu.vector_store %arg7[%c8, %c0_18], %18 {strides = array<i32>} : memref<72x256xf32, #tpu.memory_space<vmem>>, vector<8x256xf32>,
      %c0_19 = arith.constant 0 : index
      %c0_20 = arith.constant 0 : index
      %c0_21 = arith.constant 0 : index
      %c2 = arith.constant 2 : index
      %20 = vector.load %arg3[%c0_19, %c0_20, %c0_21, %c2] : memref<1x8x18x18xf32, #tpu.memory_space<vmem>>, vector<1x8x16x16xf32>
      %21 = vector.shape_cast %20 : vector<1x8x16x16xf32> to vector<8x16x16xf32>
      %22 = vector.shape_cast %21 : vector<8x16x16xf32> to vector<8x256xf32>
      %c16 = arith.constant 16 : index
      %c0_22 = arith.constant 0 : index
      %23 = vector.load %arg7[%c16, %c0_22] : memref<72x256xf32, #tpu.memory_space<vmem>>, vector<8x256xf32>
      tpu.vector_store %arg7[%c16, %c0_22], %22 {strides = array<i32>} : memref<72x256xf32, #tpu.memory_space<vmem>>, vector<8x256xf32>,
      %c0_23 = arith.constant 0 : index
      %c0_24 = arith.constant 0 : index
      %c1_25 = arith.constant 1 : index
      %c0_26 = arith.constant 0 : index
      %24 = vector.load %arg3[%c0_23, %c0_24, %c1_25, %c0_26] : memref<1x8x18x18xf32, #tpu.memory_space<vmem>>, vector<1x8x16x16xf32>
      %25 = vector.shape_cast %24 : vector<1x8x16x16xf32> to vector<8x16x16xf32>
      %26 = vector.shape_cast %25 : vector<8x16x16xf32> to vector<8x256xf32>
      %c24 = arith.constant 24 : index
      %c0_27 = arith.constant 0 : index
      %27 = vector.load %arg7[%c24, %c0_27] : memref<72x256xf32, #tpu.memory_space<vmem>>, vector<8x256xf32>
      tpu.vector_store %arg7[%c24, %c0_27], %26 {strides = array<i32>} : memref<72x256xf32, #tpu.memory_space<vmem>>, vector<8x256xf32>,
      %c0_28 = arith.constant 0 : index
      %c0_29 = arith.constant 0 : index
      %c1_30 = arith.constant 1 : index
      %c1_31 = arith.constant 1 : index
      %28 = vector.load %arg3[%c0_28, %c0_29, %c1_30, %c1_31] : memref<1x8x18x18xf32, #tpu.memory_space<vmem>>, vector<1x8x16x16xf32>
      %29 = vector.shape_cast %28 : vector<1x8x16x16xf32> to vector<8x16x16xf32>
      %30 = vector.shape_cast %29 : vector<8x16x16xf32> to vector<8x256xf32>
      %c32 = arith.constant 32 : index
      %c0_32 = arith.constant 0 : index
      %31 = vector.load %arg7[%c32, %c0_32] : memref<72x256xf32, #tpu.memory_space<vmem>>, vector<8x256xf32>
      tpu.vector_store %arg7[%c32, %c0_32], %30 {strides = array<i32>} : memref<72x256xf32, #tpu.memory_space<vmem>>, vector<8x256xf32>,
      %c0_33 = arith.constant 0 : index
      %c0_34 = arith.constant 0 : index
      %c1_35 = arith.constant 1 : index
      %c2_36 = arith.constant 2 : index
      %32 = vector.load %arg3[%c0_33, %c0_34, %c1_35, %c2_36] : memref<1x8x18x18xf32, #tpu.memory_space<vmem>>, vector<1x8x16x16xf32>
      %33 = vector.shape_cast %32 : vector<1x8x16x16xf32> to vector<8x16x16xf32>
      %34 = vector.shape_cast %33 : vector<8x16x16xf32> to vector<8x256xf32>
      %c40 = arith.constant 40 : index
      %c0_37 = arith.constant 0 : index
      %35 = vector.load %arg7[%c40, %c0_37] : memref<72x256xf32, #tpu.memory_space<vmem>>, vector<8x256xf32>
      tpu.vector_store %arg7[%c40, %c0_37], %34 {strides = array<i32>} : memref<72x256xf32, #tpu.memory_space<vmem>>, vector<8x256xf32>,
      %c0_38 = arith.constant 0 : index
      %c0_39 = arith.constant 0 : index
      %c2_40 = arith.constant 2 : index
      %c0_41 = arith.constant 0 : index
      %36 = vector.load %arg3[%c0_38, %c0_39, %c2_40, %c0_41] : memref<1x8x18x18xf32, #tpu.memory_space<vmem>>, vector<1x8x16x16xf32>
      %37 = vector.shape_cast %36 : vector<1x8x16x16xf32> to vector<8x16x16xf32>
      %38 = vector.shape_cast %37 : vector<8x16x16xf32> to vector<8x256xf32>
      %c48 = arith.constant 48 : index
      %c0_42 = arith.constant 0 : index
      %39 = vector.load %arg7[%c48, %c0_42] : memref<72x256xf32, #tpu.memory_space<vmem>>, vector<8x256xf32>
      tpu.vector_store %arg7[%c48, %c0_42], %38 {strides = array<i32>} : memref<72x256xf32, #tpu.memory_space<vmem>>, vector<8x256xf32>,
      %c0_43 = arith.constant 0 : index
      %c0_44 = arith.constant 0 : index
      %c2_45 = arith.constant 2 : index
      %c1_46 = arith.constant 1 : index
      %40 = vector.load %arg3[%c0_43, %c0_44, %c2_45, %c1_46] : memref<1x8x18x18xf32, #tpu.memory_space<vmem>>, vector<1x8x16x16xf32>
      %41 = vector.shape_cast %40 : vector<1x8x16x16xf32> to vector<8x16x16xf32>
      %42 = vector.shape_cast %41 : vector<8x16x16xf32> to vector<8x256xf32>
      %c56 = arith.constant 56 : index
      %c0_47 = arith.constant 0 : index
      %43 = vector.load %arg7[%c56, %c0_47] : memref<72x256xf32, #tpu.memory_space<vmem>>, vector<8x256xf32>
      tpu.vector_store %arg7[%c56, %c0_47], %42 {strides = array<i32>} : memref<72x256xf32, #tpu.memory_space<vmem>>, vector<8x256xf32>,
      %c0_48 = arith.constant 0 : index
      %c0_49 = arith.constant 0 : index
      %c2_50 = arith.constant 2 : index
      %c2_51 = arith.constant 2 : index
      %44 = vector.load %arg3[%c0_48, %c0_49, %c2_50, %c2_51] : memref<1x8x18x18xf32, #tpu.memory_space<vmem>>, vector<1x8x16x16xf32>
      %45 = vector.shape_cast %44 : vector<1x8x16x16xf32> to vector<8x16x16xf32>
      %46 = vector.shape_cast %45 : vector<8x16x16xf32> to vector<8x256xf32>
      %c64 = arith.constant 64 : index
      %c0_52 = arith.constant 0 : index
      %47 = vector.load %arg7[%c64, %c0_52] : memref<72x256xf32, #tpu.memory_space<vmem>>, vector<8x256xf32>
      tpu.vector_store %arg7[%c64, %c0_52], %46 {strides = array<i32>} : memref<72x256xf32, #tpu.memory_space<vmem>>, vector<8x256xf32>,
    } else {
    }
    %c0 = arith.constant 0 : index
    %c0_1 = arith.constant 0 : index
    %3 = vector.load %arg4[%c0, %c0_1] : memref<8x72xf32, #tpu.memory_space<vmem>>, vector<8x72xf32>
    %c0_2 = arith.constant 0 : index
    %c0_3 = arith.constant 0 : index
    %4 = vector.load %arg7[%c0_2, %c0_3] : memref<72x256xf32, #tpu.memory_space<vmem>>, vector<72x256xf32>
    %cst = arith.constant dense<0.000000e+00> : vector<8x256xf32>
    %5 = tpu.matmul %3, %4, %cst {dimension_numbers = #tpu.dot_dimension_numbers<[1], [0], [0], [1], [0, 0, 1, 1], [], []>} : vector<8x72xf32>, vector<72x256xf32>, vector<8x256xf32> -> vector<8x256xf32>
    %c0_4 = arith.constant 0 : index
    %c0_5 = arith.constant 0 : index
    %6 = vector.load %arg5[%c0_4, %c0_5] : memref<8x1xf32, #tpu.memory_space<vmem>>, vector<8x1xf32>
    %7 = vector.broadcast %6 : vector<8x1xf32> to vector<8x256xf32>
    %8 = arith.addf %5, %7 : vector<8x256xf32>
    %c0_6 = arith.constant 0 : index
    %c0_7 = arith.constant 0 : index
    %c0_8 = arith.constant 0 : index
    %9 = vector.load %arg6[%c0_6, %c0_7, %c0_8] : memref<1x8x256xf32, #tpu.memory_space<vmem>>, vector<1x8x256xf32>
    %10 = vector.shape_cast %9 : vector<1x8x256xf32> to vector<8x256xf32>
    %11 = vector.shape_cast %8 : vector<8x256xf32> to vector<1x8x256xf32>
    tpu.vector_store %arg6[%c0_6, %c0_7, %c0_8], %11 {strides = array<i32>} : memref<1x8x256xf32, #tpu.memory_space<vmem>>, vector<1x8x256xf32>,
    return
  }
  func.func @transform_0(%arg0: i32, %arg1: i32, %arg2: i32) -> (i32, i32, i32, i32) {
    %c0_i32 = arith.constant 0 : i32
    %c0_i32_0 = arith.constant 0 : i32
    %c0_i32_1 = arith.constant 0 : i32
    %c0_i32_2 = arith.constant 0 : i32
    return %arg0, %c0_i32, %c0_i32_0, %c0_i32_1 : i32, i32, i32, i32
  }
  func.func @transform_1(%arg0: i32, %arg1: i32, %arg2: i32) -> (i32, i32) {
    %c0_i32 = arith.constant 0 : i32
    %c0_i32_0 = arith.constant 0 : i32
    return %arg2, %c0_i32 : i32, i32
  }
  func.func @transform_2(%arg0: i32, %arg1: i32, %arg2: i32) -> (i32, i32) {
    %c0_i32 = arith.constant 0 : i32
    %c0_i32_0 = arith.constant 0 : i32
    return %arg2, %c0_i32 : i32, i32
  }
  func.func @transform_3(%arg0: i32, %arg1: i32, %arg2: i32) -> (i32, i32, i32) {
    %c0_i32 = arith.constant 0 : i32
    return %arg0, %arg2, %arg1 : i32, i32, i32
  }
}

</mosaic_0001>

<bundles_post_ra>
// kernel: tpu_custom_call.1
= control target key start
LH: loop header
LB: loop body
LE: loop exit
PB: predicated region body
PF: predicated region fallthrough
CT: control target
= control target key end

     0   :  { %8 = vsyncpa [#allocation4], 0  ;;  %s6731_s0 = inlined_call_operand.vmem [shape: f32[2,8,18,18], index: 0, kind: input, shape index: {}]   ;;  %s6732_s1 = inlined_call_operand.vmem [shape: f32[8,72], index: 1, kind: input, shape index: {}]   ;;  %s6733_s2 = inlined_call_operand.vmem [shape: f32[8,1], index: 2, kind: input, shape index: {}]   ;;  %s6734_s3 = inlined_call_operand.hbm [shape: f32[2,8,256], index: 3, kind: output, shape index: {}]  }
   0x1   :  { %10 = vsyncpa [#allocation4 + $0x1], 0  ;;  %s4637_s12 = smov 0   ;;  %s4639_s13 = smov 0  }
   0x2   :  { %s4641_s14 = smov 0   ;;  %s4643_s15 = smov 0  }
   0x3   :  { %s4645_s16 = smov 0   ;;  %s4647_s17 = smov 0  }
   0x4 LB: > { %s4088_s18 = sadd.s32 4294967295, %s4601_s17   ;;  %s4089_s19 = sadd.s32 4294967294, %s4601_s17   ;;  %s4601_s17 = sphi %s4647_s17, %s16_s17   ;;  %s4597_s16 = sphi %s4645_s16, %s7005_s16   ;;  %s4593_s15 = sphi %s4643_s15, %s7004_s15   ;;  %s4589_s14 = sphi %s4641_s14, %s7003_s14   ;;  %s4585_s13 = sphi %s4639_s13, %s7002_s13   ;;  %s4581_s12 = sphi %s4637_s12, %s7001_s12  }
   0x5   : > { %s35_s20 = sadd.s32 1, %s4597_s16  ;;  %s124_s21 = sadd.s32 1, %s4589_s14 }
   0x6   : > { %p37_p0 = scmp.ge.s32.totalorder %s35_s20, 2  ;;  %p134_p1 = scmp.ne.s32.totalorder %s4589_s14, %s4585_s13 }
   0x7   : > { %p135_p2 = scmp.eq.s32.totalorder %s4088_s18, 1  ;;  %p140_p3 = scmp.ne.s32.totalorder %s4585_s13, %s4581_s12 }
   0x8   : > { %s7007_s20 = smov (%p37_p0, %s35_s20), 0  ;;  %p141_p5 = scmp.eq.s32.totalorder %s4089_s19, 1 }
   0x9   : > { %p4677_p4 = por %p135_p2, %p134_p1  ;;  %s117_s23 = ssub.s32 %s4597_s16, %s7007_s20 }
   0xa   : > { %p4094_p6 = scmp.ge.s32.totalorder %s4601_s17, 1  ;;  %p122_p7 = scmp.eq.s32.totalorder %s117_s23, 0 }
   0xb   : > { %p4684_p8 = por %p141_p5, %p140_p3  ;;  %p181_p9 = scmp.lt.s32.totalorder %s4601_s17, 3 }
   0xc   : > { %s4690_s25 = scalar_select %p122_p7, %s4589_s14, %s124_s21  }
   0xd   : > { %p182_p10 = pnand %p4094_p6, %p181_p9 }
   0xf   : > { %185 = sbr.rel (%p182_p10) target bundleno = 810 (0x32a), region = 32 }
  0x16   : > { %p213_p11 = scmp.lt.s32.totalorder %s4593_s15, 1  ;;  %v252_v0 = vlaneseq  ;;  %v4603_v1 = vmov 1983009808   ;;  %v4604_v3 = vmov 1934713408   ;;  %s4605_s4 = smov 127  }
  0x17   : > { %v250_v2 = vunpack.c.l.s4 %v4603_v1  ;;  %v314_v4 = vunpack.c.l.s4 %v4604_v3  ;;  %s4606_s5 = smov 48   ;;  %s4607_s6 = smov 16   ;;  %vm575_vm0 = vcmask 130048   ;;  %vm577_vm1 = vcmask 261120  }
  0x18   : > { %s214_s26 = scalar_select %p213_p11, %s4593_s15, 1  ;;  %v253_v6 = vshrl.u32 %v252_v0, 7  ;;  %vm579_vm2 = vcmask 392192   ;;  %vm581_vm3 = vcmask 523264   ;;  %vm583_vm4 = vcmask 654336  }
  0x19   : > { %v251_v5 = vunpack.c.0.s8 %v250_v2  ;;  %v315_v7 = vunpack.c.0.s8 %v314_v4  ;;  %s4608_s7 = smov 32   ;;  %s4609_s8 = smov 64   ;;  %vm585_vm5 = vcmask 785408   ;;  %vm587_vm6 = vcmask 916480  }
  0x1a   : > { %s4120_s27 = smul.u32 192, %s214_s26  ;;  %s4610_s9 = smov 80   ;;  %vm3887_vm7 = vcmask 588800  }
  0x1b   : > { %v4708_v11 = vsub.s32 %v251_v5, %v253_v6  ;;  %v4744_v23 = vsub.s32 %v315_v7, %v253_v6  ;;  %s4611_s10 = smov 96   ;;  %s4612_s11 = smov 112  }
  0x1c   : > { %s4697_s30 = scalar_lea.vmem %s6731_s0, %s4120_s27  ;;  %s4613_s18 = smov 126  }
  0x1d   : > { %v4700_v8 = vld [vmem:[%s4697_s30] sm:$0xff]  ;;  %v4703_v9 = vld [vmem:[%s4697_s30 + $0x8] sm:$0xff]  ;;  %v4706_v10 = vld [vmem:[%s4697_s30 + $0x18] sm:$0xff]  ;;  %s210_s27 = sand.u32 1, %s4585_s13   ;;  %s4103_s29 = sshll.u32 %s4593_s15, 8 }
  0x1e   : > { %630 = vrot.lane.b32.xlu1 %v4700_v8, %s4605_s4  ;;  %632 = vrot.lane.b32.xlu0 %v4703_v9, %s4605_s4  ;;  %v4715_v12 = vld [vmem:[%s4697_s30 + $0x20] sm:$0xff]  ;;  %v4718_v13 = vld [vmem:[%s4697_s30 + $0x30] sm:$0xff]  ;;  %s4095_s28 = sshll.u32 %s210_s27, 4 }
  0x1f   : > { %v4721_v14 = vld [vmem:[%s4697_s30 + $0x38] sm:$0xff]  ;;  %v4724_v15 = vld [vmem:[%s4697_s30 + $0x48] sm:$0xff]  ;;  %v4727_v16 = vld [vmem:[%s4697_s30 + $0x50] sm:$0xff]  ;;  %v247_v17 = vcombine.low %v4700_v8, %v4718_v13  ;;  %v248_v18 = vcombine.high %v4700_v8, %v4718_v13 }
  0x20   : > { %v4734_v19 = vld [vmem:[%s4697_s30 + $0x60] sm:$0xff]  ;;  %v4737_v20 = vld [vmem:[%s4697_s30 + $0x68] sm:$0xff]  ;;  %v4740_v21 = vld [vmem:[%s4697_s30 + $0x78] sm:$0xff]  ;;  %v263_v22 = vcombine.low %v4706_v10, %v4724_v15  ;;  %v383_v24 = vcombine.low %v4703_v9, %v4721_v14  ;;  %v399_v25 = vcombine.low %v4715_v12, %v4727_v16  ;;  %v264_v31 = vcombine.high %v4706_v10, %v4724_v15 }
  0x21   : > { %v4751_v26 = vld [vmem:[%s4697_s30 + $0x80] sm:$0xff]  ;;  %v4754_v27 = vld [vmem:[%s4697_s30 + $0x90] sm:$0xff]  ;;  %v4757_v28 = vld [vmem:[%s4697_s30 + $0x98] sm:$0xff]  ;;  %v255_v29 = vrot.slane %v247_v17, %v4708_v11  ;;  %v4761_v30 = vrot.slane %v248_v18, %v4708_v11  ;;  %v384_v32 = vcombine.high %v4703_v9, %v4721_v14  ;;  %v400_v42 = vcombine.high %v4715_v12, %v4727_v16 }
  0x22   : > { %634 = vrot.lane.b32.xlu1 %v4706_v10, %s4605_s4  ;;  %v4770_v33 = vld [vmem:[%s4697_s30 + $0xa8] sm:$0xff]  ;;  %v4773_v34 = vld [vmem:[%s4697_s30 + $0xb0] sm:$0xff]  ;;  %v271_v35 = vrot.slane %v263_v22, %v4708_v11  ;;  %v279_v36 = vcombine.low %v4734_v19, %v4754_v27  ;;  %v391_v37 = vrot.slane %v383_v24, %v4708_v11  ;;  %v407_v38 = vrot.slane %v399_v25, %v4708_v11 }
  0x23   : > { %v295_v39 = vcombine.low %v4740_v21, %v4770_v33  ;;  %v415_v40 = vcombine.low %v4737_v20, %v4757_v28  ;;  %v431_v41 = vcombine.low %v4751_v26, %v4773_v34  ;;  %v278_v53 = vrot.slane %v264_v31, %v4708_v11 }
  0x24   : > { %v287_v43 = vrot.slane %v279_v36, %v4708_v11  ;;  %v312_v44 = vcombine.high %v255_v29, %v271_v35  ;;  %v448_v45 = vcombine.high %v391_v37, %v407_v38  ;;  %v311_v46 = vcombine.low %v255_v29, %v271_v35 }
  0x25   : > { %v303_v47 = vrot.slane %v295_v39, %v4708_v11  ;;  %v423_v48 = vrot.slane %v415_v40, %v4708_v11  ;;  %v439_v49 = vrot.slane %v431_v41, %v4708_v11  ;;  %v447_v50 = vcombine.low %v391_v37, %v407_v38 }
  0x26   : > { %v326_v51 = vrot.slane %v312_v44, %v4744_v23  ;;  %v462_v52 = vrot.slane %v448_v45, %v4744_v23  ;;  %v280_v54 = vcombine.high %v4734_v19, %v4754_v27  ;;  %v4798_v57 = vrot.slane %v311_v46, %v4744_v23 }
  0x27   : > { %v344_v55 = vcombine.high %v287_v43, %v303_v47  ;;  %v480_v56 = vcombine.high %v423_v48, %v439_v49  ;;  %v343_v58 = vcombine.low %v287_v43, %v303_v47  ;;  %v4801_v59 = vrot.slane %v447_v50, %v4744_v23 }
  0x28   : > { %6823 = vst [vmem:[#allocation6_spill] sm:$0xff] %v4798_v57  ;;  %v479_v60 = vcombine.low %v423_v48, %v439_v49  ;;  %v294_v61 = vrot.slane %v280_v54, %v4708_v11  ;;  %v296_v62 = vcombine.high %v4740_v21, %v4770_v33  ;;  %v398_v2 = vrot.slane %v384_v32, %v4708_v11 }
  0x29   : > { %6824 = vst [vmem:[#allocation7_spill] sm:$0xff] %v4801_v59  ;;  %v358_v63 = vrot.slane %v344_v55, %v4744_v23  ;;  %v494_v0 = vrot.slane %v480_v56, %v4744_v23  ;;  %v4809_v1 = vrot.slane %v343_v58, %v4744_v23  ;;  %v327_v5 = vcombine.low %v4761_v30, %v278_v53 }
  0x2a   : > { %v4813_v3 = vrot.slane %v479_v60, %v4744_v23  ;;  %v310_v4 = vrot.slane %v296_v62, %v4708_v11  ;;  %v414_v6 = vrot.slane %v400_v42, %v4708_v11  ;;  %v416_v31 = vcombine.high %v4737_v20, %v4757_v28 }
  0x2b   : > { %6825 = vst [vmem:[#allocation8_spill] sm:$0xff] %v4809_v1  ;;  %v378_v7 = vcombine.high %v326_v51, %v358_v63  ;;  %v514_v17 = vcombine.high %v462_v52, %v494_v0  ;;  %v376_v18 = vcombine.high %v4798_v57, %v4809_v1  ;;  %v432_v35 = vcombine.high %v4751_v26, %v4773_v34  ;;  %v5245_v57 = vld [vmem:[%s4697_s30 + $0x6a] sm:$0xff] }
  0x2c   : > { %6826 = vst [vmem:[#allocation9_spill] sm:$0xff] %v4813_v3  ;;  %v512_v25 = vcombine.high %v4801_v59, %v4813_v3  ;;  %v359_v29 = vcombine.low %v294_v61, %v310_v4  ;;  %v463_v36 = vcombine.low %v398_v2, %v414_v6  ;;  %v377_v37 = vcombine.low %v326_v51, %v358_v63 }
  0x2d   : > { %v4199_v32 = vpack.i.bf16 %v514_v17, %v378_v7  ;;  %v335_v39 = vrot.slane %v327_v5, %v4744_v23  ;;  %v430_v40 = vrot.slane %v416_v31, %v4708_v11  ;;  %v513_v41 = vcombine.low %v462_v52, %v494_v0 }
  0x2e   : > { %v4189_v38 = vpack.i.bf16 %v512_v25, %v376_v18  ;;  %v367_v42 = vrot.slane %v359_v29, %v4744_v23  ;;  %v446_v43 = vrot.slane %v432_v35, %v4708_v11  ;;  %v328_v44 = vcombine.high %v4761_v30, %v278_v53 }
  0x2f   : > { %4200 = vrot.lane.b32.xlu1 %v4199_v32, %s4606_s5  ;;  %v360_v45 = vcombine.high %v294_v61, %v310_v4  ;;  %v471_v46 = vrot.slane %v463_v36, %v4744_v23  ;;  %v4194_v47 = vpack.i.bf16 %v513_v41, %v377_v37  ;;  %v464_v48 = vcombine.high %v398_v2, %v414_v6 }
  0x30   : > { %4190 = vrot.lane.b32.xlu0 %v4189_v38, %s4607_s6  ;;  %v495_v49 = vcombine.low %v430_v40, %v446_v43  ;;  %v342_v50 = vrot.slane %v328_v44, %v4744_v23  ;;  %v496_v52 = vcombine.high %v430_v40, %v446_v43  ;;  %v379_v55 = vcombine.low %v335_v39, %v367_v42 }
  0x31   : > { %v374_v51 = vrot.slane %v360_v45, %v4744_v23  ;;  %v478_v54 = vrot.slane %v464_v48, %v4744_v23  ;;  %v380_v53 = vcombine.high %v335_v39, %v367_v42 }
  0x32   : > { %v503_v56 = vrot.slane %v495_v49, %v4744_v23  ;;  %v510_v30 = vrot.slane %v496_v52, %v4744_v23 }
  0x33   : > { %v381_v58 = vcombine.low %v342_v50, %v374_v51  ;;  %v382_v60 = vcombine.high %v342_v50, %v374_v51 }
  0x34   : > { %4195 = vrot.lane.b32.xlu0 %v4194_v47, %s4608_s7  ;;  %v515_v61 = vcombine.low %v471_v46, %v503_v56  ;;  %v517_v62 = vcombine.low %v478_v54, %v510_v30  ;;  %v516_v63 = vcombine.high %v471_v46, %v503_v56  ;;  %v518_v0 = vcombine.high %v478_v54, %v510_v30  ;;  %v4984_v30 = vld [vmem:[%s4697_s30 + $0x19] sm:$0xff] }
  0x36   : > { %v4204_v2 = vpack.i.bf16 %v515_v61, %v379_v55  ;;  %v4209_v4 = vpack.i.bf16 %v516_v63, %v380_v53  ;;  %v4214_v5 = vpack.i.bf16 %v517_v62, %v381_v58  ;;  %v4219_v6 = vpack.i.bf16 %v518_v0, %v382_v60  ;;  %v4990_v58 = vld [vmem:[%s4697_s30 + $0x1] sm:$0xff]  ;;  %v4993_v60 = vld [vmem:[%s4697_s30 + $0x49] sm:$0xff]  ;;  %v5000_v62 = vld [vmem:[%s4697_s30 + $0x31] sm:$0xff] }
  0x37   : > { %v5003_v63 = vld [vmem:[%s4697_s30 + $0x79] sm:$0xff] }
  0x38   : > { %4205 = vrot.lane.b32.xlu1 %v4204_v2, %s4609_s8  ;;  %4210 = vrot.lane.b32.xlu0 %v4209_v4, %s4610_s9  ;;  %v5012_v4 = vld [vmem:[%s4697_s30 + $0x61] sm:$0xff] }
  0x3c   : > { %4215 = vrot.lane.b32.xlu1 %v4214_v5, %s4611_s10  ;;  %4220 = vrot.lane.b32.xlu0 %v4219_v6, %s4612_s11 }
  0x40   : > { %638 = vrot.lane.b32.xlu1 %v4718_v13, %s4605_s4  ;;  %636 = vrot.lane.b32.xlu0 %v4715_v12, %s4605_s4 }
  0x44   : > { %642 = vrot.lane.b32.xlu1 %v4724_v15, %s4605_s4  ;;  %640 = vrot.lane.b32.xlu0 %v4721_v14, %s4605_s4 }
  0x48   : > { %646 = vrot.lane.b32.xlu1 %v4734_v19, %s4605_s4  ;;  %644 = vrot.lane.b32.xlu0 %v4727_v16, %s4605_s4 }
  0x4c   : > { %650 = vrot.lane.b32.xlu1 %v4740_v21, %s4605_s4  ;;  %648 = vrot.lane.b32.xlu0 %v4737_v20, %s4605_s4 }
  0x50   : > { %654 = vrot.lane.b32.xlu1 %v4754_v27, %s4605_s4  ;;  %652 = vrot.lane.b32.xlu0 %v4751_v26, %s4605_s4 }
  0x54   : > { %658 = vrot.lane.b32.xlu1 %v4770_v33, %s4605_s4  ;;  %656 = vrot.lane.b32.xlu0 %v4757_v28, %s4605_s4 }
  0x58   : > { %660 = vrot.lane.b32.xlu0 %v4773_v34, %s4605_s4  ;;  %1060 = vrot.lane.b32.xlu1 %v4715_v12, %s4613_s18  ;;  %v1811_v12 = vld [vmem:[%s4697_s30 + $0x39] sm:$0xff] }
  0x5c   : > { %1056 = vrot.lane.b32.xlu0 %v4703_v9, %s4613_s18  ;;  %1068 = vrot.lane.b32.xlu1 %v4727_v16, %s4613_s18  ;;  %v1809_v9 = vld [vmem:[%s4697_s30 + $0x21] sm:$0xff]  ;;  %v1819_v16 = vld [vmem:[%s4697_s30 + $0x99] sm:$0xff] }
  0x60   : > { %1064 = vrot.lane.b32.xlu0 %v4721_v14, %s4613_s18  ;;  %1076 = vrot.lane.b32.xlu1 %v4751_v26, %s4613_s18  ;;  %v1815_v14 = vld [vmem:[%s4697_s30 + $0x69] sm:$0xff] }
  0x64   : > { %1072 = vrot.lane.b32.xlu0 %v4737_v20, %s4613_s18  ;;  %1084 = vrot.lane.b32.xlu1 %v4773_v34, %s4613_s18 }
  0x68   : > { %1080 = vrot.lane.b32.xlu0 %v4757_v28, %s4613_s18  ;;  %1058 = vrot.lane.b32.xlu1 %v4706_v10, %s4613_s18  ;;  %v1813_v10 = vld [vmem:[%s4697_s30 + $0x51] sm:$0xff] }
  0x69   : > { %v1614_v20 = vcombine.low %v1809_v9, %v1813_v10  ;;  %v1615_v28 = vcombine.high %v1809_v9, %v1813_v10 }
  0x6b   : > { %v4925_v7 = vrot.slane %v1614_v20, %v4708_v11  ;;  %v1629_v31 = vrot.slane %v1615_v28, %v4708_v11 }
  0x6c   : > { %1054 = vrot.lane.b32.xlu0 %v4700_v8, %s4613_s18  ;;  %1066 = vrot.lane.b32.xlu1 %v4724_v15, %s4613_s18  ;;  %v1807_v8 = vld [vmem:[%s4697_s30 + $0x9] sm:$0xff]  ;;  %v1821_v15 = vld [vmem:[%s4697_s30 + $0xb1] sm:$0xff] }
  0x70   : > { %1062 = vrot.lane.b32.xlu0 %v4718_v13, %s4613_s18  ;;  %1074 = vrot.lane.b32.xlu1 %v4740_v21, %s4613_s18  ;;  %v1817_v13 = vld [vmem:[%s4697_s30 + $0x81] sm:$0xff]  ;;  %v1630_v21 = vcombine.low %v1815_v14, %v1819_v16 }
  0x71   : > { %v1646_v26 = vcombine.low %v1817_v13, %v1821_v15  ;;  %v1647_v18 = vcombine.high %v1817_v13, %v1821_v15 }
  0x72   : > { %v4928_v17 = vrot.slane %v1630_v21, %v4708_v11 }
  0x73   : > { %v4931_v25 = vrot.slane %v1646_v26, %v4708_v11  ;;  %v1661_v37 = vrot.slane %v1647_v18, %v4708_v11 }
  0x74   : > { %1070 = vrot.lane.b32.xlu0 %v4734_v19, %s4613_s18  ;;  %1082 = vrot.lane.b32.xlu1 %v4770_v33, %s4613_s18  ;;  %v1598_v19 = vcombine.low %v1807_v8, %v1811_v12  ;;  %v1631_v33 = vcombine.high %v1815_v14, %v1819_v16 }
  0x75   : > { %v1695_v39 = vcombine.high %v4928_v17, %v4931_v25 }
  0x76   : > { %v4922_v34 = vrot.slane %v1598_v19, %v4708_v11  ;;  %v1645_v32 = vrot.slane %v1631_v33, %v4708_v11 }
  0x77   : > { %v4951_v45 = vrot.slane %v1695_v39, %v4744_v23 }
  0x78   : > { %1078 = vrot.lane.b32.xlu0 %v4754_v27, %s4613_s18  ;;  %1844 = vrot.lane.b32.xlu1 %v1809_v9, %s4605_s4  ;;  %v1599_v27 = vcombine.high %v1807_v8, %v1811_v12  ;;  %v1663_v36 = vcombine.high %v4922_v34, %v4925_v7  ;;  %v1710_v43 = vcombine.low %v1645_v32, %v1661_v37 }
  0x79   : > { %v1711_v44 = vcombine.high %v1645_v32, %v1661_v37  ;;  %6828 = vst [vmem:[#allocation11_spill] sm:$0xff] %v4951_v45  ;;  %v5295_v45 = vld [vmem:[%s4697_s30 + $0xb2] sm:$0xff] }
  0x7a   : > { %v1613_v29 = vrot.slane %v1599_v27, %v4708_v11  ;;  %v4948_v42 = vrot.slane %v1663_v36, %v4744_v23  ;;  %v4962_v48 = vrot.slane %v1710_v43, %v4744_v23 }
  0x7b   : > { %v4965_v49 = vrot.slane %v1711_v44, %v4744_v23 }
  0x7c   : > { %1840 = vrot.lane.b32.xlu0 %v1807_v8, %s4605_s4  ;;  %1852 = vrot.lane.b32.xlu1 %v1813_v10, %s4605_s4  ;;  %v1678_v40 = vcombine.low %v1613_v29, %v1629_v31  ;;  %v1679_v41 = vcombine.high %v1613_v29, %v1629_v31  ;;  %6827 = vst [vmem:[#allocation10_spill] sm:$0xff] %v4948_v42  ;;  %6831 = vst [vmem:[#allocation14_spill] sm:$0xff] %v4962_v48 }
  0x7d   : > { %6832 = vst [vmem:[#allocation15_spill] sm:$0xff] %v4965_v49 }
  0x7e   : > { %v4954_v46 = vrot.slane %v1678_v40, %v4744_v23  ;;  %v4957_v47 = vrot.slane %v1679_v41, %v4744_v23 }
  0x80   : > { %1848 = vrot.lane.b32.xlu0 %v1811_v12, %s4605_s4  ;;  %1860 = vrot.lane.b32.xlu1 %v1817_v13, %s4605_s4  ;;  %6829 = vst [vmem:[#allocation12_spill] sm:$0xff] %v4954_v46  ;;  %6830 = vst [vmem:[#allocation13_spill] sm:$0xff] %v4957_v47 }
  0x84   : > { %1856 = vrot.lane.b32.xlu0 %v1815_v14, %s4605_s4  ;;  %1868 = vrot.lane.b32.xlu1 %v1821_v15, %s4605_s4 }
  0x88   : > { %1864 = vrot.lane.b32.xlu0 %v1819_v16, %s4605_s4  ;;  %2268 = vrot.lane.b32.xlu1 %v1809_v9, %s4613_s18 }
  0x8c   : > { %2264 = vrot.lane.b32.xlu0 %v1807_v8, %s4613_s18  ;;  %2276 = vrot.lane.b32.xlu1 %v1813_v10, %s4613_s18 }
  0x90   : > { %2272 = vrot.lane.b32.xlu0 %v1811_v12, %s4613_s18  ;;  %2284 = vrot.lane.b32.xlu1 %v1817_v13, %s4613_s18  ;;  %v631_v53 = vpop.permute.xlu1 %630  ;;  %v633_v61 = vpop.permute.xlu0 %632 }
  0x94   : > { %2280 = vrot.lane.b32.xlu0 %v1815_v14, %s4613_s18  ;;  %2292 = vrot.lane.b32.xlu1 %v1821_v15, %s4613_s18  ;;  %v635_v0 = vpop.permute.xlu1 %634 }
  0x98   : > { %2288 = vrot.lane.b32.xlu0 %v1819_v16, %s4613_s18  ;;  %1842 = vrot.lane.b32.xlu1 %v4984_v30, %s4605_s4 }
  0x9c   : > { %1838 = vrot.lane.b32.xlu0 %v4990_v58, %s4605_s4  ;;  %1850 = vrot.lane.b32.xlu1 %v4993_v60, %s4605_s4 }
  0xa0   : > { %1846 = vrot.lane.b32.xlu0 %v5000_v62, %s4605_s4  ;;  %1858 = vrot.lane.b32.xlu1 %v5003_v63, %s4605_s4 }
  0xa1   : > { %v5014_v5 = vpop.permute.xlu1 %4200 }
  0xa2   : > { %v5009_v2 = vpop.permute.xlu0 %4190  ;;  %6834 = vst [vmem:[#allocation17_spill] sm:$0xff] %v5014_v5  ;;  %v5248_v5 = vld [vmem:[%s4697_s30 + $0x52] sm:$0xff] }
  0xa3   : > { %6833 = vst [vmem:[#allocation16_spill] sm:$0xff] %v5009_v2  ;;  %v5263_v2 = vld [vmem:[%s4697_s30 + $0x22] sm:$0xff] }
  0xa4   : > { %1854 = vrot.lane.b32.xlu0 %v5012_v4, %s4605_s4 }
  0xa6   : > { %v5018_v6 = vpop.permute.xlu0 %4195 }
  0xa7   : > { %6835 = vst [vmem:[#allocation18_spill] sm:$0xff] %v5018_v6 }
  0xaa   : > { %v5020_v9 = vpop.permute.xlu1 %4205  ;;  %v5022_v8 = vpop.permute.xlu0 %4210 }
  0xab   : > { %6836 = vst [vmem:[#allocation19_spill] sm:$0xff] %v5020_v9  ;;  %6837 = vst [vmem:[#allocation20_spill] sm:$0xff] %v5022_v8  ;;  %v5229_v8 = vld [vmem:[%s4697_s30 + $0x3a] sm:$0xff]  ;;  %v5232_v9 = vld [vmem:[%s4697_s30 + $0x22] sm:$0xff] }
  0xae   : > { %v5024_v10 = vpop.permute.xlu1 %4215  ;;  %v5026_v12 = vpop.permute.xlu0 %4220 }
  0xaf   : > { %6838 = vst [vmem:[#allocation21_spill] sm:$0xff] %v5024_v10  ;;  %6839 = vst [vmem:[#allocation22_spill] sm:$0xff] %v5026_v12 }
  0xb2   : > { %v639_v13 = vpop.permute.xlu1 %638  ;;  %v637_v14 = vpop.permute.xlu0 %636 }
  0xb3   : > { %v678_v28 = vcombine.low %v631_v53, %v639_v13  ;;  %v679_v29 = vcombine.high %v631_v53, %v639_v13 }
  0xb5   : > { %v686_v39 = vrot.slane %v678_v28, %v4708_v11  ;;  %v5031_v54 = vrot.slane %v679_v29, %v4708_v11 }
  0xb6   : > { %v643_v15 = vpop.permute.xlu1 %642  ;;  %v641_v16 = vpop.permute.xlu0 %640 }
  0xb7   : > { %v694_v27 = vcombine.low %v635_v0, %v643_v15  ;;  %v695_v31 = vcombine.high %v635_v0, %v643_v15  ;;  %v814_v40 = vcombine.low %v633_v61, %v641_v16  ;;  %v815_v41 = vcombine.high %v633_v61, %v641_v16 }
  0xb9   : > { %v702_v32 = vrot.slane %v694_v27, %v4708_v11  ;;  %v5034_v52 = vrot.slane %v695_v31, %v4708_v11  ;;  %v822_v61 = vrot.slane %v814_v40, %v4708_v11 }
  0xba   : > { %v647_v19 = vpop.permute.xlu1 %646  ;;  %v645_v20 = vpop.permute.xlu0 %644 }
  0xbb   : > { %v830_v36 = vcombine.low %v637_v14, %v645_v20  ;;  %v831_v56 = vcombine.high %v637_v14, %v645_v20  ;;  %v742_v53 = vcombine.low %v686_v39, %v702_v32  ;;  %v829_v14 = vrot.slane %v815_v41, %v4708_v11 }
  0xbd   : > { %v838_v0 = vrot.slane %v830_v36, %v4708_v11  ;;  %v845_v29 = vrot.slane %v831_v56, %v4708_v11 }
  0xbe   : > { %v651_v21 = vpop.permute.xlu1 %650  ;;  %v649_v26 = vpop.permute.xlu0 %648 }
  0xbf   : > { %v878_v40 = vcombine.low %v822_v61, %v838_v0  ;;  %v879_v24 = vcombine.high %v822_v61, %v838_v0 }
  0xc1   : > { %v5069_v50 = vrot.slane %v878_v40, %v4744_v23 }
  0xc2   : > { %v655_v33 = vpop.permute.xlu1 %654  ;;  %v653_v18 = vpop.permute.xlu0 %652 }
  0xc3   : > { %v710_v37 = vcombine.low %v647_v19, %v655_v33  ;;  %v711_v13 = vcombine.high %v647_v19, %v655_v33  ;;  %v743_v19 = vcombine.high %v686_v39, %v702_v32  ;;  %6842 = vst [vmem:[#allocation25_spill] sm:$0xff] %v5069_v50 }
  0xc5   : > { %v718_v15 = vrot.slane %v710_v37, %v4708_v11  ;;  %v725_v41 = vrot.slane %v711_v13, %v4708_v11 }
  0xc6   : > { %v659_v43 = vpop.permute.xlu1 %658  ;;  %v657_v44 = vpop.permute.xlu0 %656 }
  0xc7   : > { %v726_v55 = vcombine.low %v651_v21, %v659_v43  ;;  %v727_v22 = vcombine.high %v651_v21, %v659_v43  ;;  %v846_v16 = vcombine.low %v649_v26, %v657_v44  ;;  %v847_v20 = vcombine.high %v649_v26, %v657_v44 }
  0xc9   : > { %v734_v27 = vrot.slane %v726_v55, %v4708_v11  ;;  %v741_v31 = vrot.slane %v727_v22, %v4708_v11  ;;  %v5046_v55 = vrot.slane %v742_v53, %v4744_v23  ;;  %v854_v44 = vrot.slane %v846_v16, %v4708_v11 }
  0xca   : > { %v661_v21 = vpop.permute.xlu0 %660  ;;  %v5041_v28 = vpop.permute.xlu1 %1060  ;;  %v861_v56 = vrot.slane %v847_v20, %v4708_v11  ;;  %v894_v53 = vcombine.low %v829_v14, %v845_v29 }
  0xcb   : > { %v774_v43 = vcombine.low %v718_v15, %v734_v27  ;;  %v775_v36 = vcombine.high %v718_v15, %v734_v27  ;;  %v862_v33 = vcombine.low %v653_v18, %v661_v21  ;;  %v863_v37 = vcombine.high %v653_v18, %v661_v21  ;;  %6840 = vst [vmem:[#allocation23_spill] sm:$0xff] %v5046_v55 }
  0xcc   : > { %v790_v15 = vcombine.low %v725_v41, %v741_v31  ;;  %v758_v27 = vcombine.low %v5031_v54, %v5034_v52  ;;  %v895_v21 = vcombine.high %v829_v14, %v845_v29  ;;  %v791_v14 = vcombine.high %v725_v41, %v741_v31 }
  0xcd   : > { %v5050_v26 = vrot.slane %v774_v43, %v4744_v23  ;;  %v870_v22 = vrot.slane %v862_v33, %v4708_v11  ;;  %v877_v32 = vrot.slane %v863_v37, %v4708_v11  ;;  %v789_v0 = vrot.slane %v775_v36, %v4744_v23 }
  0xce   : > { %v5056_v39 = vpop.permute.xlu0 %1056  ;;  %v5058_v18 = vpop.permute.xlu1 %1068  ;;  %v757_v33 = vrot.slane %v743_v19, %v4744_v23  ;;  %v893_v37 = vrot.slane %v879_v24, %v4744_v23  ;;  %v798_v19 = vrot.slane %v790_v15, %v4744_v23  ;;  %v902_v24 = vrot.slane %v894_v53, %v4744_v23 }
  0xcf   : > { %6841 = vst [vmem:[#allocation24_spill] sm:$0xff] %v5050_v26  ;;  %v910_v61 = vcombine.low %v854_v44, %v870_v22  ;;  %v911_v16 = vcombine.high %v854_v44, %v870_v22  ;;  %v926_v20 = vcombine.low %v861_v56, %v877_v32  ;;  %v927_v43 = vcombine.high %v861_v56, %v877_v32 }
  0xd0   : > { %v808_v29 = vcombine.low %v757_v33, %v789_v0  ;;  %v807_v40 = vcombine.high %v5046_v55, %v5050_v26  ;;  %v766_v31 = vrot.slane %v758_v27, %v4744_v23  ;;  %v805_v10 = vrot.slane %v791_v14, %v4744_v23 }
  0xd1   : > { %v925_v51 = vrot.slane %v911_v16, %v4744_v23  ;;  %v5072_v36 = vrot.slane %v910_v61, %v4744_v23  ;;  %v934_v13 = vrot.slane %v926_v20, %v4744_v23  ;;  %v759_v61 = vcombine.high %v5031_v54, %v5034_v52 }
  0xd2   : > { %v5075_v38 = vpop.permute.xlu0 %1064  ;;  %v5077_v44 = vpop.permute.xlu1 %1076  ;;  %v941_v41 = vrot.slane %v927_v43, %v4744_v23  ;;  %v909_v49 = vrot.slane %v895_v21, %v4744_v23  ;;  %v810_v52 = vcombine.low %v766_v31, %v798_v19  ;;  %v809_v54 = vcombine.high %v757_v33, %v789_v0 }
  0xd3   : > { %6843 = vst [vmem:[#allocation26_spill] sm:$0xff] %v5072_v36  ;;  %v944_v56 = vcombine.low %v893_v37, %v925_v51  ;;  %v943_v22 = vcombine.high %v5069_v50, %v5072_v36  ;;  %v946_v53 = vcombine.low %v902_v24, %v934_v13  ;;  %v945_v20 = vcombine.high %v893_v37, %v925_v51  ;;  %v5214_v36 = vld [vmem:[%s4697_s30 + $0xa] sm:$0xff] }
  0xd4   : > { %v773_v27 = vrot.slane %v759_v61, %v4744_v23  ;;  %v948_v43 = vcombine.low %v909_v49, %v941_v41  ;;  %v1254_v51 = vcombine.low %v5041_v28, %v5058_v18  ;;  %v1238_v37 = vcombine.low %v5056_v39, %v5075_v38 }
  0xd5   : > { %v4229_v15 = vpack.i.bf16 %v944_v56, %v808_v29  ;;  %v4224_v16 = vpack.i.bf16 %v943_v22, %v807_v40  ;;  %v4239_v29 = vpack.i.bf16 %v946_v53, %v810_v52  ;;  %v4234_v56 = vpack.i.bf16 %v945_v20, %v809_v54 }
  0xd6   : > { %v5091_v35 = vpop.permute.xlu0 %1072  ;;  %v5093_v12 = vpop.permute.xlu1 %1084  ;;  %v947_v14 = vcombine.high %v902_v24, %v934_v13  ;;  %v812_v0 = vcombine.low %v773_v27, %v805_v10  ;;  %v811_v61 = vcombine.high %v766_v31, %v798_v19  ;;  %v5115_v13 = vrot.slane %v1254_v51, %v4708_v11  ;;  %v5133_v19 = vld [vmem:[%s4697_s30 + $0x91] sm:$0xff] }
  0xd7   : > { %4230 = vrot.lane.b32.xlu0 %v4229_v15, %s4608_s7  ;;  %4225 = vrot.lane.b32.xlu1 %v4224_v16, %s4607_s6  ;;  %v1286_v21 = vcombine.low %v5077_v44, %v5093_v12  ;;  %v949_v16 = vcombine.high %v909_v49, %v941_v41  ;;  %v5118_v53 = vrot.slane %v1238_v37, %v4708_v11 }
  0xd8   : > { %v4249_v15 = vpack.i.bf16 %v948_v43, %v812_v0  ;;  %v4244_v24 = vpack.i.bf16 %v947_v14, %v811_v61  ;;  %v813_v49 = vcombine.high %v773_v27, %v805_v10 }
  0xd9   : > { %v5121_v20 = vrot.slane %v1286_v21, %v4708_v11  ;;  %v1302_v41 = vcombine.low %v5118_v53, %v5115_v13 }
  0xda   : > { %v5106_v40 = vpop.permute.xlu0 %1080  ;;  %v5108_v22 = vpop.permute.xlu1 %1058  ;;  %v4254_v31 = vpack.i.bf16 %v949_v16, %v813_v49 }
  0xdb   : > { %v1270_v33 = vcombine.low %v5091_v35, %v5106_v40  ;;  %4240 = vrot.lane.b32.xlu0 %v4239_v29, %s4609_s8  ;;  %4235 = vrot.lane.b32.xlu1 %v4234_v56, %s4606_s5  ;;  %v5147_v56 = vld [vmem:[%s4697_s30 + $0xa9] sm:$0xff]  ;;  %v5150_v10 = vrot.slane %v1302_v41, %v4744_v23 }
  0xdd   : > { %v5124_v52 = vrot.slane %v1270_v33, %v4708_v11  ;;  %6845 = vst [vmem:[#allocation28_spill] sm:$0xff] %v5150_v10 }
  0xde   : > { %v5126_v54 = vpop.permute.xlu0 %1054  ;;  %v5128_v29 = vpop.permute.xlu1 %1066 }
  0xdf   : > { %4250 = vrot.lane.b32.xlu0 %v4249_v15, %s4611_s10  ;;  %4245 = vrot.lane.b32.xlu1 %v4244_v24, %s4610_s9  ;;  %v1334_v43 = vcombine.low %v5124_v52, %v5121_v20  ;;  %v1118_v0 = vcombine.low %v5108_v22, %v5128_v29 }
  0xe1   : > { %v5153_v27 = vrot.slane %v1334_v43, %v4744_v23 }
  0xe2   : > { %v5139_v51 = vpop.permute.xlu0 %1062  ;;  %v5141_v37 = vpop.permute.xlu1 %1074 }
  0xe3   : > { %6844 = vst [vmem:[#allocation27_spill] sm:$0xff] %v5141_v37  ;;  %1862 = vrot.lane.b32.xlu0 %v5133_v19, %s4605_s4  ;;  %4255 = vrot.lane.b32.xlu1 %v4254_v31, %s4612_s11  ;;  %6846 = vst [vmem:[#allocation29_spill] sm:$0xff] %v5153_v27  ;;  %v1102_v33 = vcombine.low %v5126_v54, %v5139_v51  ;;  %v5182_v31 = vrot.slane %v1118_v0, %v4708_v11 }
  0xe5   : > { %6851 = vst [vmem:[#allocation34_spill] sm:$0xff] %v5182_v31  ;;  %v5185_v41 = vrot.slane %v1102_v33, %v4708_v11 }
  0xe6   : > { %v5155_v14 = vpop.permute.xlu0 %1070  ;;  %v5157_v21 = vpop.permute.xlu1 %1082 }
  0xe7   : > { %6847 = vst [vmem:[#allocation30_spill] sm:$0xff] %v5155_v14  ;;  %6848 = vst [vmem:[#allocation31_spill] sm:$0xff] %v5157_v21  ;;  %2262 = vrot.lane.b32.xlu0 %v4990_v58, %s4613_s18  ;;  %1866 = vrot.lane.b32.xlu1 %v5147_v56, %s4605_s4  ;;  %v1150_v61 = vcombine.low %v5141_v37, %v5157_v21  ;;  %v1166_v0 = vcombine.low %v5185_v41, %v5182_v31  ;;  %v5382_v31 = vld [vmem:[%s4697_s30 + $0x7a] sm:$0xff]  ;;  %v5403_v21 = vld [vmem:[%s4697_s30 + $0xaa] sm:$0xff] }
  0xe8   : > { %6852 = vst [vmem:[#allocation35_spill] sm:$0xff] %v5185_v41 }
  0xe9   : > { %v5188_v43 = vrot.slane %v1150_v61, %v4708_v11  ;;  %v5217_v50 = vrot.slane %v1166_v0, %v4744_v23 }
  0xea   : > { %v5169_v15 = vpop.permute.xlu0 %1078  ;;  %v5171_v16 = vpop.permute.xlu1 %1844 }
  0xeb   : > { %6849 = vst [vmem:[#allocation32_spill] sm:$0xff] %v5169_v15  ;;  %6850 = vst [vmem:[#allocation33_spill] sm:$0xff] %v5171_v16  ;;  %v1134_v49 = vcombine.low %v5155_v14, %v5169_v15  ;;  %2270 = vrot.lane.b32.xlu0 %v5000_v62, %s4613_s18  ;;  %2266 = vrot.lane.b32.xlu1 %v4984_v30, %s4613_s18 }
  0xec   : > { %6853 = vst [vmem:[#allocation36_spill] sm:$0xff] %v5188_v43  ;;  %6859 = vst [vmem:[#allocation42_spill] sm:$0xff] %v5217_v50 }
  0xed   : > { %v5191_v24 = vrot.slane %v1134_v49, %v4708_v11 }
  0xee   : > { %v5193_v32 = vpop.permute.xlu0 %1840  ;;  %v5195_v47 = vpop.permute.xlu1 %1852 }
  0xef   : > { %6854 = vst [vmem:[#allocation37_spill] sm:$0xff] %v5191_v24  ;;  %6855 = vst [vmem:[#allocation38_spill] sm:$0xff] %v5193_v32  ;;  %2278 = vrot.lane.b32.xlu0 %v5012_v4, %s4613_s18  ;;  %2274 = vrot.lane.b32.xlu1 %v4993_v60, %s4613_s18  ;;  %v1198_v33 = vcombine.low %v5191_v24, %v5188_v43  ;;  %v2038_v48 = vcombine.low %v5171_v16, %v5195_v47  ;;  %v5361_v24 = vld [vmem:[%s4697_s30 + $0x4a] sm:$0xff] }
  0xf0   : > { %6856 = vst [vmem:[#allocation39_spill] sm:$0xff] %v5195_v47 }
  0xf1   : > { %v5220_v26 = vrot.slane %v1198_v33, %v4744_v23 }
  0xf2   : > { %v5205_v61 = vpop.permute.xlu0 %1848  ;;  %v5207_v49 = vpop.permute.xlu1 %1860 }
  0xf3   : > { %6857 = vst [vmem:[#allocation40_spill] sm:$0xff] %v5205_v61  ;;  %6858 = vst [vmem:[#allocation41_spill] sm:$0xff] %v5207_v49  ;;  %2286 = vrot.lane.b32.xlu0 %v5133_v19, %s4613_s18  ;;  %2282 = vrot.lane.b32.xlu1 %v5003_v63, %s4613_s18  ;;  %v2022_v46 = vcombine.low %v5193_v32, %v5205_v61  ;;  %v4502_v32 = vld [vmem:[%s4697_s30 + $0xa] ss:$48 sps:$4 sm:$0xff]  }
  0xf4   : > { %6860 = vst [vmem:[#allocation43_spill] sm:$0xff] %v5220_v26 }
  0xf5   : > { %v5282_v61 = vrot.slane %v2022_v46, %v4708_v11 }
  0xf6   : > { %v5222_v55 = vpop.permute.xlu0 %1856  ;;  %v5234_v1 = vpop.permute.xlu1 %1868 }
  0xf7   : > { %6861 = vst [vmem:[#allocation44_spill] sm:$0xff] %v5222_v55  ;;  %3048 = vrot.lane.b32.xlu0 %v5214_v36, %s4605_s4  ;;  %2290 = vrot.lane.b32.xlu1 %v5147_v56, %s4613_s18  ;;  %6862 = vst [vmem:[#allocation45_spill] sm:$0xff] %v5234_v1  ;;  %v2070_v33 = vcombine.low %v5207_v49, %v5234_v1  ;;  %v2822_v49 = vcombine.low %v5263_v2, %v5248_v5  ;;  %v5273_v1 = vld [vmem:[%s4697_s30 + $0x9a] sm:$0xff] }
  0xf8   : > { %6866 = vst [vmem:[#allocation49_spill] sm:$0xff] %v5282_v61  ;;  %v2839_v41 = vcombine.high %v5245_v57, %v5273_v1 }
  0xf9   : > { %v5285_v16 = vrot.slane %v2070_v33, %v4708_v11  ;;  %v5301_v46 = vrot.slane %v2822_v49, %v4708_v11  ;;  %v5306_v33 = vld [vmem:[%s4697_s30 + $0x2] sm:$0xff] }
  0xfa   : > { %v5236_v0 = vpop.permute.xlu0 %1864  ;;  %v5258_v59 = vpop.permute.xlu1 %2268 }
  0xfb   : > { %6863 = vst [vmem:[#allocation46_spill] sm:$0xff] %v5236_v0  ;;  %3056 = vrot.lane.b32.xlu0 %v5229_v8, %s4605_s4  ;;  %3052 = vrot.lane.b32.xlu1 %v5232_v9, %s4605_s4  ;;  %v2054_v3 = vcombine.low %v5222_v55, %v5236_v0  ;;  %v5276_v55 = vld [vmem:[%s4697_s30 + $0x82] sm:$0xff]  ;;  %v5279_v0 = vrot.slane %v2038_v48, %v4708_v11  ;;  %6867 = vst [vmem:[#allocation50_spill] sm:$0xff] %v5285_v16 }
  0xfc   : > { %v5298_v48 = vrot.slane %v4502_v32, %v4708_v11  ;;  %6870 = vst [vmem:[#allocation53_spill] sm:$0xff] %v5301_v46  ;;  %v2854_v26 = vcombine.low %v5276_v55, %v5295_v45 }
  0xfd   : > { %6865 = vst [vmem:[#allocation48_spill] sm:$0xff] %v5279_v0  ;;  %v5288_v47 = vrot.slane %v2054_v3, %v4708_v11  ;;  %v2838_v3 = vcombine.low %v5245_v57, %v5273_v1  ;;  %v2086_v10 = vcombine.low %v5282_v61, %v5279_v0  ;;  %v5331_v0 = vld [vmem:[%s4697_s30 + $0x32] sm:$0xff] }
  0xfe   : > { %v5260_v6 = vpop.permute.xlu0 %2264  ;;  %6869 = vst [vmem:[#allocation52_spill] sm:$0xff] %v5298_v48  ;;  %v5308_v42 = vpop.permute.xlu1 %2276  ;;  %v5326_v27 = vrot.slane %v2854_v26, %v4708_v11  ;;  %v2871_v61 = vcombine.high %v5298_v48, %v5301_v46 }
  0xff   : > { %6864 = vst [vmem:[#allocation47_spill] sm:$0xff] %v5260_v6  ;;  %3064 = vrot.lane.b32.xlu0 %v5245_v57, %s4605_s4  ;;  %3060 = vrot.lane.b32.xlu1 %v5248_v5, %s4605_s4  ;;  %6868 = vst [vmem:[#allocation51_spill] sm:$0xff] %v5288_v47  ;;  %v2118_v32 = vcombine.low %v5288_v47, %v5285_v16  ;;  %v5319_v49 = vrot.slane %v2838_v3, %v4708_v11  ;;  %v5334_v47 = vld [vmem:[%s4697_s30 + $0x1a] sm:$0xff] }
 0x100   : > { %6873 = vst [vmem:[#allocation56_spill] sm:$0xff] %v5326_v27  ;;  %v5337_v3 = vrot.slane %v2086_v10, %v4744_v23  ;;  %v5355_v10 = vrot.slane %v2871_v61, %v4744_v23 }
 0x101   : > { %6872 = vst [vmem:[#allocation55_spill] sm:$0xff] %v5319_v49  ;;  %v5340_v16 = vrot.slane %v2118_v32, %v4744_v23  ;;  %v2903_v48 = vcombine.high %v5319_v49, %v5326_v27  ;;  %v5358_v32 = vld [vmem:[%s4697_s30 + $0x62] sm:$0xff]  ;;  %v2855_v27 = vcombine.high %v5276_v55, %v5295_v45 }
 0x102   : > { %v5310_v50 = vpop.permute.xlu0 %2272  ;;  %6874 = vst [vmem:[#allocation57_spill] sm:$0xff] %v5337_v3  ;;  %v5344_v43 = vpop.permute.xlu1 %2284  ;;  %6878 = vst [vmem:[#allocation61_spill] sm:$0xff] %v5355_v10  ;;  %v2462_v3 = vcombine.low %v5258_v59, %v5308_v42 }
 0x103   : > { %3072 = vrot.lane.b32.xlu0 %v5273_v1, %s4605_s4  ;;  %3068 = vrot.lane.b32.xlu1 %v5276_v55, %s4605_s4  ;;  %6871 = vst [vmem:[#allocation54_spill] sm:$0xff] %v5310_v50  ;;  %6875 = vst [vmem:[#allocation58_spill] sm:$0xff] %v5340_v16  ;;  %v5364_v46 = vrot.slane %v2903_v48, %v4744_v23  ;;  %v5379_v48 = vld [vmem:[%s4697_s30 + $0x92] sm:$0xff]  ;;  %v2446_v61 = vcombine.low %v5260_v6, %v5310_v50 }
 0x104   : > { %6876 = vst [vmem:[#allocation59_spill] sm:$0xff] %v5344_v43  ;;  %v5406_v49 = vrot.slane %v2462_v3, %v4708_v11  ;;  %v2823_v3 = vcombine.high %v5263_v2, %v5248_v5 }
 0x105   : > { %6879 = vst [vmem:[#allocation62_spill] sm:$0xff] %v5364_v46  ;;  %v5409_v46 = vrot.slane %v2446_v61, %v4708_v11 }
 0x106   : > { %v5346_v26 = vpop.permute.xlu0 %2280  ;;  %v5384_v14 = vpop.permute.xlu1 %2292 }
 0x107   : > { %3046 = vrot.lane.b32.xlu0 %v5306_v33, %s4605_s4  ;;  %3076 = vrot.lane.b32.xlu1 %v5295_v45, %s4605_s4  ;;  %6877 = vst [vmem:[#allocation60_spill] sm:$0xff] %v5346_v26  ;;  %6880 = vst [vmem:[#allocation63_spill] sm:$0xff] %v5384_v14  ;;  %v2494_v16 = vcombine.low %v5344_v43, %v5384_v14  ;;  %v2510_v61 = vcombine.low %v5409_v46, %v5406_v49 }
 0x109   : > { %v5416_v10 = vrot.slane %v2494_v16, %v4708_v11 }
 0x10a   : > { %v5386_v15 = vpop.permute.xlu0 %2288 }
 0x10b   : > { %3054 = vrot.lane.b32.xlu0 %v5331_v0, %s4605_s4  ;;  %3050 = vrot.lane.b32.xlu1 %v5334_v47, %s4605_s4  ;;  %6881 = vst [vmem:[#allocation64_spill] sm:$0xff] %v5386_v15  ;;  %v2478_v37 = vcombine.low %v5346_v26, %v5386_v15  ;;  %v4519_v26 = vld [vmem:[%s4697_s30 + $0xe] ss:$48 sps:$4 sm:$0xff]   ;;  %v5435_v15 = vrot.slane %v2510_v61, %v4744_v23 }
 0x10c   : > { %v2821_v16 = vrot.slane %v4519_v26, %v4708_v11  ;;  %v1462_v26 = vcombine.low %v4990_v58, %v5000_v62 }
 0x10d   : > { %v5419_v43 = vrot.slane %v2478_v37, %v4708_v11  ;;  %v2837_v37 = vrot.slane %v2823_v3, %v4708_v11  ;;  %6882 = vst [vmem:[#allocation65_spill] sm:$0xff] %v5435_v15  ;;  %v1478_v3 = vcombine.low %v4984_v30, %v4993_v60 }
 0x10f   : > { %3062 = vrot.lane.b32.xlu0 %v5358_v32, %s4605_s4  ;;  %3058 = vrot.lane.b32.xlu1 %v5361_v24, %s4605_s4  ;;  %v2886_v14 = vcombine.low %v2821_v16, %v2837_v37  ;;  %v2887_v61 = vcombine.high %v2821_v16, %v2837_v37  ;;  %v1486_v6 = vrot.slane %v1478_v3, %v4708_v11 }
 0x111   : > { %v5464_v16 = vrot.slane %v2887_v61, %v4744_v23 }
 0x113   : > { %3070 = vrot.lane.b32.xlu0 %v5379_v48, %s4605_s4  ;;  %3066 = vrot.lane.b32.xlu1 %v5382_v31, %s4605_s4 }
 0x117   : > { %3472 = vrot.lane.b32.xlu0 %v5214_v36, %s4613_s18  ;;  %3074 = vrot.lane.b32.xlu1 %v5403_v21, %s4605_s4  ;;  %v2542_v36 = vcombine.low %v5419_v43, %v5416_v10 }
 0x119   : > { %v5438_v2 = vrot.slane %v2542_v36, %v4744_v23  ;;  %v1470_v36 = vrot.slane %v1462_v26, %v4708_v11 }
 0x11b   : > { %3480 = vrot.lane.b32.xlu0 %v5229_v8, %s4613_s18  ;;  %3476 = vrot.lane.b32.xlu1 %v5232_v9, %s4613_s18  ;;  %6883 = vst [vmem:[#allocation66_spill] sm:$0xff] %v5438_v2  ;;  %v2853_v9 = vrot.slane %v2839_v41, %v4708_v11  ;;  %v2869_v8 = vrot.slane %v2855_v27, %v4708_v11 }
 0x11c   : > { %v5457_v41 = vrot.slane %v2886_v14, %v4744_v23 }
 0x11d   : > { %v2918_v27 = vcombine.low %v2853_v9, %v2869_v8  ;;  %v2919_v37 = vcombine.high %v2853_v9, %v2869_v8  ;;  %v6886_v9 = vcombine.low %v4928_v17, %v4931_v25  ;;  %v1463_v25 = vcombine.high %v4990_v58, %v5000_v62  ;;  %v6905_v17 = vld [vmem:[#allocation16_spill] sm:$0xff] }
 0x11e   : > { %v1303_v58 = vcombine.high %v5118_v53, %v5115_v13  ;;  %v1271_v62 = vcombine.high %v5091_v35, %v5106_v40  ;;  %v1511_v35 = vcombine.high %v5003_v63, %v5147_v56  ;;  %v1119_v53 = vcombine.high %v5108_v22, %v5128_v29  ;;  %v6896_v29 = vld [vmem:[#allocation36_spill] sm:$0xff] }
 0x11f   : > { %3488 = vrot.lane.b32.xlu0 %v5245_v57, %s4613_s18  ;;  %3484 = vrot.lane.b32.xlu1 %v5248_v5, %s4613_s18  ;;  %v1494_v57 = vcombine.low %v5012_v4, %v5133_v19  ;;  %v1510_v5 = vcombine.low %v5003_v63, %v5147_v56  ;;  %v5469_v50 = vrot.slane %v2918_v27, %v4744_v23  ;;  %v6891_v56 = vld [vmem:[#allocation27_spill] sm:$0xff] }
 0x120   : > { %v5472_v14 = vrot.slane %v2919_v37, %v4744_v23  ;;  %v5484_v8 = vrot.slane %v6886_v9, %v4744_v23  ;;  %v1287_v27 = vcombine.high %v5077_v44, %v5093_v12  ;;  %v1495_v12 = vcombine.high %v5012_v4, %v5133_v19  ;;  %v6890_v19 = vld [vmem:[#allocation31_spill] sm:$0xff] }
 0x121   : > { %v1502_v26 = vrot.slane %v1494_v57, %v4708_v11  ;;  %v1518_v3 = vrot.slane %v1510_v5, %v4708_v11  ;;  %v1526_v57 = vcombine.low %v1470_v36, %v1486_v6  ;;  %v1239_v5 = vcombine.high %v5056_v39, %v5075_v38 }
 0x122   : > { %6887 = vst [vmem:[#allocation68_spill] sm:$0xff] %v5484_v8  ;;  %v1335_v38 = vcombine.high %v5124_v52, %v5121_v20  ;;  %v1527_v39 = vcombine.high %v1470_v36, %v1486_v6  ;;  %v5542_v13 = vrot.slane %v1287_v27, %v4708_v11  ;;  %v1317_v63 = vrot.slane %v1303_v58, %v4744_v23  ;;  %v6892_v36 = vld [vmem:[#allocation32_spill] sm:$0xff] }
 0x123   : > { %3496 = vrot.lane.b32.xlu0 %v5273_v1, %s4613_s18  ;;  %3492 = vrot.lane.b32.xlu1 %v5276_v55, %s4613_s18  ;;  %v6884_v1 = vcombine.low %v4922_v34, %v4925_v7  ;;  %v1558_v37 = vcombine.low %v1502_v26, %v1518_v3  ;;  %v5539_v40 = vrot.slane %v1239_v5, %v4708_v11  ;;  %v4193_v7 = vunpack.i.h.bf16 %v6905_v17 }
 0x124   : > { %v5549_v6 = vrot.slane %v1271_v62, %v4708_v11  ;;  %v1349_v20 = vrot.slane %v1335_v38, %v4744_v23  ;;  %v1103_v52 = vcombine.high %v5126_v54, %v5139_v51  ;;  %v1541_v51 = vrot.slane %v1527_v39, %v4744_v23 }
 0x125   : > { %v5478_v55 = vrot.slane %v6884_v1, %v4744_v23  ;;  %v5545_v4 = vrot.slane %v1558_v37, %v4744_v23  ;;  %v6893_v1 = vld [vmem:[#allocation30_spill] sm:$0xff]  ;;  %v5578_v27 = vrot.slane %v1511_v35, %v4708_v11  ;;  %v5585_v62 = vrot.slane %v1119_v53, %v4708_v11 }
 0x126   : > { %v1135_v9 = vcombine.high %v6893_v1, %v6892_v36  ;;  %v1350_v58 = vcombine.low %v5549_v6, %v5542_v13  ;;  %v5592_v38 = vrot.slane %v1103_v52, %v4708_v11  ;;  %v1368_v39 = vcombine.low %v1317_v63, %v1349_v20 }
 0x127   : > { %6885 = vst [vmem:[#allocation67_spill] sm:$0xff] %v5478_v55  ;;  %3470 = vrot.lane.b32.xlu0 %v5306_v33, %s4613_s18  ;;  %3500 = vrot.lane.b32.xlu1 %v5295_v45, %s4613_s18  ;;  %v1479_v33 = vcombine.high %v4984_v30, %v4993_v60  ;;  %v1255_v45 = vcombine.high %v5041_v28, %v5058_v18  ;;  %6889 = vst [vmem:[#allocation70_spill] sm:$0xff] %v5545_v4 }
 0x128   : > { %v1727_v30 = vcombine.high %v5478_v55, %v5484_v8  ;;  %v5523_v60 = vrot.slane %v1463_v25, %v4708_v11  ;;  %v5530_v28 = vrot.slane %v1526_v57, %v4744_v23  ;;  %v6897_v25 = vld [vmem:[#allocation37_spill] sm:$0xff]  ;;  %v5598_v35 = vrot.slane %v1135_v9, %v4708_v11 }
 0x129   : > { %v5533_v18 = vrot.slane %v1479_v33, %v4708_v11  ;;  %v5536_v44 = vrot.slane %v1255_v45, %v4708_v11  ;;  %v6898_v57 = vld [vmem:[#allocation29_spill] sm:$0xff]  ;;  %v6899_v33 = vld [vmem:[#allocation28_spill] sm:$0xff]  ;;  %v5571_v45 = vrot.slane %v1495_v12, %v4708_v11  ;;  %v1358_v9 = vrot.slane %v1350_v58, %v4744_v23 }
 0x12a   : > { %6888 = vst [vmem:[#allocation69_spill] sm:$0xff] %v5530_v28  ;;  %v1591_v54 = vcombine.high %v5530_v28, %v5545_v4 }
 0x12b   : > { %3478 = vrot.lane.b32.xlu0 %v5331_v0, %s4613_s18  ;;  %3474 = vrot.lane.b32.xlu1 %v5334_v47, %s4613_s18  ;;  %v1559_v47 = vcombine.high %v1502_v26, %v1518_v3  ;;  %v1151_v0 = vcombine.high %v6891_v56, %v6890_v19  ;;  %v6894_v26 = vld [vmem:[#allocation34_spill] sm:$0xff]  ;;  %v6895_v3 = vld [vmem:[#allocation35_spill] sm:$0xff]  ;;  %v1318_v37 = vcombine.low %v5539_v40, %v5536_v44 }
 0x12c   : > { %v1167_v22 = vcombine.high %v6895_v3, %v6894_v26  ;;  %v6900_v56 = vld [vmem:[#allocation43_spill] sm:$0xff]  ;;  %v1542_v52 = vcombine.low %v5523_v60, %v5533_v18  ;;  %v5619_v3 = vpop.permute.xlu0 %1838 }
 0x12d   : > { %v1573_v5 = vrot.slane %v1559_v47, %v4744_v23  ;;  %v5595_v12 = vrot.slane %v1151_v0, %v4708_v11  ;;  %v1574_v0 = vcombine.low %v5571_v45, %v5578_v27  ;;  %v1326_v1 = vrot.slane %v1318_v37, %v4744_v23 }
 0x12e   : > { %v1181_v47 = vrot.slane %v1167_v22, %v4744_v23  ;;  %v6902_v22 = vld [vmem:[#allocation10_spill] sm:$0xff]  ;;  %v1550_v37 = vrot.slane %v1542_v52, %v4744_v23  ;;  %v1319_v52 = vcombine.high %v5539_v40, %v5536_v44  ;;  %v6911_v44 = vld [vmem:[#allocation12_spill] sm:$0xff] }
 0x12f   : > { %3486 = vrot.lane.b32.xlu0 %v5358_v32, %s4613_s18  ;;  %3482 = vrot.lane.b32.xlu1 %v5361_v24, %s4613_s18  ;;  %v1199_v32 = vcombine.high %v6897_v25, %v6896_v29  ;;  %v1367_v24 = vcombine.high %v6899_v33, %v6898_v57  ;;  %v1214_v26 = vcombine.low %v5598_v35, %v5595_v12  ;;  %v6903_v29 = vld [vmem:[#allocation11_spill] sm:$0xff]  ;;  %v6912_v40 = vld [vmem:[#allocation14_spill] sm:$0xff] }
 0x130   : > { %v6904_v25 = vcombine.low %v6902_v22, %v6903_v29  ;;  %v1582_v58 = vrot.slane %v1574_v0, %v4744_v23  ;;  %v1593_v4 = vcombine.high %v1541_v51, %v1573_v5  ;;  %v1351_v0 = vcombine.high %v5549_v6, %v5542_v13 }
 0x131   : > { %v1213_v53 = vrot.slane %v1199_v32, %v4744_v23  ;;  %v4259_v19 = vpack.i.bf16 %v1727_v30, %v1367_v24  ;;  %v1182_v30 = vcombine.low %v5592_v38, %v5585_v62  ;;  %v1222_v28 = vrot.slane %v1214_v26, %v4744_v23 }
 0x132   : > { %v4269_v32 = vpack.i.bf16 %v6904_v25, %v1368_v39  ;;  %v1370_v39 = vcombine.low %v1326_v1, %v1358_v9  ;;  %v6907_v25 = vld [vmem:[#allocation18_spill] sm:$0xff]  ;;  %v6913_v13 = vcombine.low %v6911_v44, %v6912_v40 }
 0x133   : > { %3494 = vrot.lane.b32.xlu0 %v5379_v48, %s4613_s18  ;;  %3490 = vrot.lane.b32.xlu1 %v5382_v31, %s4613_s18  ;;  %v6901_v48 = vld [vmem:[#allocation42_spill] sm:$0xff]  ;;  %v1592_v31 = vcombine.low %v1541_v51, %v1573_v5  ;;  %v1232_v61 = vcombine.low %v1181_v47, %v1213_v53  ;;  %v1190_v34 = vrot.slane %v1182_v30, %v4744_v23  ;;  %v5641_v51 = vpop.permute.xlu0 %1846 }
 0x134   : > { %v1231_v36 = vcombine.high %v6901_v48, %v6900_v56  ;;  %v4289_v6 = vpack.i.bf16 %v6913_v13, %v1370_v39  ;;  %v6920_v13 = vld [vmem:[#allocation58_spill] sm:$0xff] }
 0x135   : > { %v1234_v5 = vcombine.low %v1190_v34, %v1222_v28 }
 0x136   : > { %v4264_v24 = vpack.i.bf16 %v1591_v54, %v1231_v36  ;;  %v6906_v54 = vcombine.high %v6902_v22, %v6903_v29  ;;  %v1233_v36 = vcombine.high %v1181_v47, %v1213_v53  ;;  %v1594_v47 = vcombine.low %v1550_v37, %v1582_v58  ;;  %v6908_v53 = vld [vmem:[#allocation7_spill] sm:$0xff] }
 0x137   : > { %3498 = vrot.lane.b32.xlu1 %v5403_v21, %s4613_s18  ;;  %4260 = vrot.lane.b32.xlu0 %v4259_v19, %s4607_s6  ;;  %v5617_v21 = vpop.permute.xlu1 %1842  ;;  %v1369_v19 = vcombine.high %v1317_v63, %v1349_v20  ;;  %v4274_v20 = vpack.i.bf16 %v1592_v31, %v1232_v61  ;;  %v1371_v61 = vcombine.high %v1326_v1, %v1358_v9  ;;  %v6909_v31 = vld [vmem:[#allocation9_spill] sm:$0xff]  ;;  %v4197_v9 = vunpack.i.l.bf16 %v6907_v25  ;;  %v5666_v39 = vpop.permute.xlu0 %1854 }
 0x138   : > { %v6910_v26 = vcombine.low %v6908_v53, %v6909_v31  ;;  %v4284_v29 = vpack.i.bf16 %v1593_v4, %v1233_v36  ;;  %v1595_v1 = vcombine.high %v1550_v37, %v1582_v58  ;;  %v6916_v58 = vld [vmem:[#allocation48_spill] sm:$0xff]  ;;  %v6917_v36 = vld [vmem:[#allocation49_spill] sm:$0xff]  ;;  %v1235_v31 = vcombine.high %v1190_v34, %v1222_v28  ;;  %v6925_v34 = vld [vmem:[#allocation19_spill] sm:$0xff] }
 0x139   : > { %v4279_v63 = vpack.i.bf16 %v6906_v54, %v1369_v19  ;;  %v4192_v54 = vunpack.i.l.bf16 %v6905_v17  ;;  %v6915_v17 = vcombine.high %v6911_v44, %v6912_v40  ;;  %v6922_v40 = vld [vmem:[#allocation6_spill] sm:$0xff]  ;;  %v4208_v28 = vunpack.i.h.bf16 %v6925_v34 }
 0x13a   : > { %v589_v22 = vsel %vm575_vm0, %v6910_v26, %v4193_v7  ;;  %v5660_v7 = vrot.slane %v1351_v0, %v4744_v23  ;;  %v4294_v0 = vpack.i.bf16 %v1594_v47, %v1234_v5  ;;  %v2511_v26 = vcombine.high %v5409_v46, %v5406_v49 }
 0x13b   : > { %4270 = vrot.lane.b32.xlu0 %v4269_v32, %s4608_s7  ;;  %4265 = vrot.lane.b32.xlu1 %v4264_v24, %s4607_s6  ;;  %v4198_v32 = vunpack.i.h.bf16 %v6907_v25  ;;  %v5639_v30 = vpop.permute.xlu1 %1850  ;;  %v6914_v24 = vld [vmem:[#allocation17_spill] sm:$0xff]  ;;  %v4299_v37 = vpack.i.bf16 %v6915_v17, %v1371_v61  ;;  %v2087_v25 = vcombine.high %v6917_v36, %v6916_v58  ;;  %v2575_v61 = vcombine.high %v5435_v15, %v5438_v2  ;;  %v6923_v17 = vld [vmem:[#allocation8_spill] sm:$0xff] }
 0x13c   : > { %v4203_v19 = vunpack.i.h.bf16 %v6914_v24  ;;  %v4202_v44 = vunpack.i.l.bf16 %v6914_v24  ;;  %v6924_v58 = vcombine.low %v6922_v40, %v6923_v17  ;;  %v4207_v49 = vunpack.i.l.bf16 %v6925_v34  ;;  %v6928_v17 = vld [vmem:[#allocation24_spill] sm:$0xff] }
 0x13d   : > { %v4309_v47 = vpack.i.bf16 %v1595_v1, %v1235_v31  ;;  %v4515_v2 = vld [vmem:[%s4697_s30 + $0x6] ss:$48 sps:$4 sm:$0xff]   ;;  %v4516_v15 = vld [vmem:[%s4697_s30 + $0x1e] ss:$48 sps:$4 sm:$0xff]  }
 0x13e   : > { %v576_v5 = vsel %vm575_vm0, %v6924_v58, %v4192_v54  ;;  %v6931_v58 = vld [vmem:[#allocation26_spill] sm:$0xff] }
 0x13f   : > { %4280 = vrot.lane.b32.xlu0 %v4279_v63, %s4606_s5  ;;  %4275 = vrot.lane.b32.xlu1 %v4274_v20, %s4608_s7  ;;  %v590_v63 = vsel %vm577_vm1, %v589_v22, %v4198_v32  ;;  %v5657_v20 = vrot.slane %v1319_v52, %v4744_v23  ;;  %v5664_v4 = vpop.permute.xlu1 %1858  ;;  %v6918_v32 = vld [vmem:[#allocation50_spill] sm:$0xff]  ;;  %v6919_v52 = vld [vmem:[#allocation51_spill] sm:$0xff]  ;;  %v2543_v22 = vcombine.high %v5419_v43, %v5416_v10 }
 0x140   : > { %v2119_v53 = vcombine.high %v6919_v52, %v6918_v32  ;;  %v578_v46 = vsel %vm577_vm1, %v576_v5, %v4197_v9  ;;  %v591_v43 = vsel %vm579_vm2, %v590_v63, %v4203_v19  ;;  %v5695_v10 = vrot.slane %v2087_v25, %v4744_v23  ;;  %v6926_v25 = vld [vmem:[#allocation20_spill] sm:$0xff] }
 0x141   : > { %v1372_v24 = vcombine.low %v5657_v20, %v5660_v7  ;;  %v5703_v9 = vrot.slane %v2511_v26, %v4744_v23  ;;  %v580_v32 = vsel %vm579_vm2, %v578_v46, %v4202_v44  ;;  %v4213_v52 = vunpack.i.h.bf16 %v6926_v25  ;;  %v6930_v44 = vld [vmem:[#allocation25_spill] sm:$0xff] }
 0x142   : > { %v5700_v54 = vrot.slane %v2119_v53, %v4744_v23  ;;  %v592_v53 = vsel %vm581_vm3, %v591_v43, %v4208_v28  ;;  %v4212_v26 = vunpack.i.l.bf16 %v6926_v25  ;;  %v6932_v5 = vcombine.low %v6930_v44, %v6931_v58 }
 0x143   : > { %4290 = vrot.lane.b32.xlu0 %v4289_v6, %s4609_s8  ;;  %4285 = vrot.lane.b32.xlu1 %v4284_v29, %s4606_s5  ;;  %v6921_v6 = vld [vmem:[#allocation57_spill] sm:$0xff]  ;;  %v582_v25 = vsel %vm581_vm3, %v580_v32, %v4207_v49 }
 0x144   : > { %v2151_v29 = vcombine.high %v6921_v6, %v6920_v13  ;;  %v2152_v28 = vcombine.low %v5695_v10, %v5700_v54  ;;  %v584_v49 = vsel %vm583_vm4, %v582_v25, %v4212_v26 }
 0x146   : > { %v4304_v63 = vpack.i.bf16 %v2575_v61, %v2151_v29 }
 0x147   : > { %4300 = vrot.lane.b32.xlu0 %v4299_v37, %s4610_s9  ;;  %4295 = vrot.lane.b32.xlu1 %v4294_v0, %s4609_s8  ;;  %v5706_v37 = vrot.slane %v2543_v22, %v4744_v23  ;;  %v6927_v22 = vld [vmem:[#allocation23_spill] sm:$0xff] }
 0x148   : > { %v6929_v29 = vcombine.low %v6927_v22, %v6928_v17 }
 0x149   : > { %v4226_v36 = vpop.permute.xlu1 %4225  ;;  %v4231_v19 = vpop.permute.xlu0 %4230  ;;  %v2576_v43 = vcombine.low %v5703_v9, %v5706_v37 }
 0x14a   : > { %v4228_v1 = vunpack.i.h.bf16 %v4226_v36  ;;  %v4227_v0 = vunpack.i.l.bf16 %v4226_v36  ;;  %v4233_v31 = vunpack.i.h.bf16 %v4231_v19  ;;  %v4232_v40 = vunpack.i.l.bf16 %v4231_v19  ;;  %v6933_v36 = vld [vmem:[#allocation13_spill] sm:$0xff]  ;;  %v6934_v19 = vld [vmem:[#allocation15_spill] sm:$0xff] }
 0x14b   : > { %4310 = vrot.lane.b32.xlu0 %v4309_v47, %s4610_s9  ;;  %4305 = vrot.lane.b32.xlu1 %v4304_v63, %s4607_s6  ;;  %v6935_v63 = vcombine.low %v6933_v36, %v6934_v19 }
 0x14c   : > { %v1006_v61 = vsel %vm575_vm0, %v6929_v29, %v4227_v0  ;;  %v1013_v34 = vsel %vm575_vm0, %v6932_v5, %v4228_v1  ;;  %v593_v1 = vsel %vm583_vm4, %v592_v53, %v4213_v52 }
 0x14d   : > { %v4236_v46 = vpop.permute.xlu1 %4235  ;;  %v4241_v47 = vpop.permute.xlu0 %4240  ;;  %v4314_v57 = vpack.i.bf16 %v6935_v63, %v1372_v24  ;;  %v1014_v17 = vsel %vm577_vm1, %v1013_v34, %v4233_v31  ;;  %v1007_v29 = vsel %vm577_vm1, %v1006_v61, %v4232_v40  ;;  %v6936_v24 = vld [vmem:[#allocation21_spill] sm:$0xff]  ;;  %v4324_v34 = vpack.i.bf16 %v2576_v43, %v2152_v28 }
 0x14e   : > { %v4238_v0 = vunpack.i.h.bf16 %v4236_v46  ;;  %v4237_v22 = vunpack.i.l.bf16 %v4236_v46  ;;  %v4243_v44 = vunpack.i.h.bf16 %v4241_v47  ;;  %v4242_v58 = vunpack.i.l.bf16 %v4241_v47  ;;  %v6937_v46 = vld [vmem:[#allocation22_spill] sm:$0xff] }
 0x14f   : > { %4315 = vrot.lane.b32.xlu1 %v4314_v57, %s4611_s10  ;;  %v4218_v5 = vunpack.i.h.bf16 %v6936_v24  ;;  %v4217_v32 = vunpack.i.l.bf16 %v6936_v24  ;;  %v4223_v52 = vunpack.i.h.bf16 %v6937_v46  ;;  %v1373_v40 = vcombine.high %v5657_v20, %v5660_v7 }
 0x150   : > { %v1008_v63 = vsel %vm579_vm2, %v1007_v29, %v4237_v22  ;;  %v1015_v33 = vsel %vm579_vm2, %v1014_v17, %v4238_v0  ;;  %v4222_v57 = vunpack.i.l.bf16 %v6937_v46  ;;  %v1902_v61 = vcombine.low %v5617_v21, %v5639_v30 }
 0x151   : > { %v4246_v53 = vpop.permute.xlu1 %4245  ;;  %v4251_v31 = vpop.permute.xlu0 %4250  ;;  %v1009_v0 = vsel %vm581_vm3, %v1008_v63, %v4242_v58  ;;  %v1016_v17 = vsel %vm581_vm3, %v1015_v33, %v4243_v44  ;;  %v1886_v28 = vcombine.low %v5619_v3, %v5641_v51  ;;  %v6938_v24 = vcombine.high %v6933_v36, %v6934_v19 }
 0x152   : > { %v4248_v47 = vunpack.i.h.bf16 %v4246_v53  ;;  %v4247_v22 = vunpack.i.l.bf16 %v4246_v53  ;;  %v4253_v26 = vunpack.i.h.bf16 %v4251_v31  ;;  %v4252_v25 = vunpack.i.l.bf16 %v4251_v31 }
 0x153   : > { %4325 = vrot.lane.b32.xlu1 %v4324_v34, %s4608_s7  ;;  %v4334_v58 = vpack.i.bf16 %v6938_v24, %v1373_v40  ;;  %v2153_v63 = vcombine.high %v5695_v10, %v5700_v54  ;;  %v2577_v33 = vcombine.high %v5703_v9, %v5706_v37  ;;  %v594_v44 = vsel %vm585_vm5, %v593_v1, %v4218_v5  ;;  %v6942_v24 = vld [vmem:[#allocation38_spill] sm:$0xff] }
 0x154   : > { %v1017_v20 = vsel %vm583_vm4, %v1016_v17, %v4248_v47  ;;  %v1010_v7 = vsel %vm583_vm4, %v1009_v0, %v4247_v22  ;;  %v595_v31 = vsel %vm587_vm6, %v594_v44, %v4223_v52  ;;  %v586_v34 = vsel %vm585_vm5, %v584_v49, %v4217_v32  ;;  %v6945_v44 = vld [vmem:[#allocation45_spill] sm:$0xff] }
 0x155   : > { %v4256_v43 = vpop.permute.xlu1 %4255  ;;  %v5752_v29 = vpop.permute.xlu0 %1862  ;;  %v5765_v47 = vrot.slane %v1902_v61, %v4708_v11  ;;  %v1018_v36 = vsel %vm585_vm5, %v1017_v20, %v4253_v26  ;;  %v588_v10 = vsel %vm587_vm6, %v586_v34, %v4222_v57  ;;  %v1011_v54 = vsel %vm585_vm5, %v1010_v7, %v4252_v25 }
 0x156   : > { %v4258_v46 = vunpack.i.h.bf16 %v4256_v43  ;;  %v4257_v53 = vunpack.i.l.bf16 %v4256_v43  ;;  %v5772_v9 = vrot.slane %v1886_v28, %v4708_v11  ;;  %v1918_v37 = vcombine.low %v5666_v39, %v5752_v29  ;;  %v6941_v43 = vld [vmem:[#allocation40_spill] sm:$0xff] }
 0x157   : > { %4335 = vrot.lane.b32.xlu1 %v4334_v58, %s4612_s11  ;;  %v4344_v32 = vpack.i.bf16 %v2577_v33, %v2153_v63  ;;  %v1183_v61 = vcombine.high %v5592_v38, %v5585_v62  ;;  %v1543_v22 = vcombine.high %v5523_v60, %v5533_v18  ;;  %v1575_v0 = vcombine.high %v5571_v45, %v5578_v27  ;;  %v6939_v45 = vld [vmem:[#allocation39_spill] sm:$0xff]  ;;  %v6940_v27 = vld [vmem:[#allocation33_spill] sm:$0xff] }
 0x158   : > { %v1019_v19 = vsel %vm587_vm6, %v1018_v36, %v4258_v46  ;;  %v1012_v1 = vsel %vm587_vm6, %v1011_v54, %v4257_v53  ;;  %v1215_v26 = vcombine.high %v5598_v35, %v5595_v12  ;;  %v1950_v25 = vcombine.low %v5772_v9, %v5765_v47  ;;  %v6946_v46 = vld [vmem:[#allocation41_spill] sm:$0xff]  ;;  %v6947_v36 = vld [vmem:[#allocation46_spill] sm:$0xff] }
 0x159   : > { %v1867_v5 = vpop.permute.xlu1 %1866  ;;  %v5778_v49 = vpop.permute.xlu0 %2262  ;;  %v4104_v52 = vpack.c.bf16 %v1019_v19, %v595_v31  ;;  %v4106_v40 = vpack.c.bf16 %v1012_v1, %v588_v10  ;;  %v5793_v17 = vrot.slane %v1918_v37, %v4708_v11  ;;  %v5801_v18 = vrot.slane %v1183_v61, %v4744_v23  ;;  %v6948_v10 = vld [vmem:[#allocation44_spill] sm:$0xff] }
 0x15a   : > { %v1934_v57 = vcombine.low %v5664_v4, %v1867_v5  ;;  %v2039_v12 = vcombine.high %v6940_v27, %v6939_v45  ;;  %v5806_v35 = vrot.slane %v1543_v22, %v4744_v23  ;;  %v5809_v20 = vrot.slane %v1575_v0, %v4744_v23  ;;  %v6950_v45 = vld [vmem:[#allocation47_spill] sm:$0xff] }
 0x15b   : > { %4345 = vrot.lane.b32.xlu1 %v4344_v32, %s4606_s5  ;;  %4105 = vmatprep.subr.bf16.mxu0 %v4104_v52  ;;  %v5812_v7 = vrot.slane %v1215_v26, %v4744_v23  ;;  %v2023_v58 = vcombine.high %v6942_v24, %v6941_v43  ;;  %v5817_v63 = vrot.slane %v1950_v25, %v4744_v23  ;;  %v6951_v43 = vld [vmem:[#allocation63_spill] sm:$0xff] }
 0x15c   : > { %v5796_v62 = vrot.slane %v1934_v57, %v4708_v11  ;;  %4107 = vmatpush1.bf16.msra.mxu0 %v4106_v40  ;;  %v2071_v53 = vcombine.high %v6946_v46, %v6945_v44  ;;  %v2055_v54 = vcombine.high %v6948_v10, %v6947_v36  ;;  %v2463_v37 = vcombine.high %v5258_v59, %v5308_v42  ;;  %v6952_v24 = vld [vmem:[#allocation59_spill] sm:$0xff]  ;;  %v6954_v44 = vld [vmem:[#allocation60_spill] sm:$0xff] }
 0x15d   : > { %v2267_v38 = vpop.permute.xlu1 %2266  ;;  %v2271_v28 = vpop.permute.xlu0 %2270  ;;  %6943 = vst [vmem:[#allocation31_spill] sm:$0xff] %v5817_v63  ;;  %v5833_v52 = vrot.slane %v2039_v12, %v4708_v11  ;;  %v5836_v40 = vrot.slane %v2023_v58, %v4708_v11  ;;  %v1903_v57 = vcombine.high %v5617_v21, %v5639_v30  ;;  %v1887_v42 = vcombine.high %v5619_v3, %v5641_v51  ;;  %v6949_v30 = vld [vmem:[#allocation54_spill] sm:$0xff] }
 0x15e   : > { %v1982_v60 = vcombine.low %v5793_v17, %v5796_v62  ;;  %v5843_v59 = vrot.slane %v2071_v53, %v4708_v11  ;;  %v1935_v22 = vcombine.high %v5664_v4, %v1867_v5  ;;  %v2310_v0 = vcombine.low %v5778_v49, %v2271_v28  ;;  %v6953_v5 = vld [vmem:[#allocation64_spill] sm:$0xff] }
 0x15f   : > { %v5853_v21 = vrot.slane %v2463_v37, %v4708_v11  ;;  %v2447_v27 = vcombine.high %v6950_v45, %v6949_v30  ;;  %v2495_v58 = vcombine.high %v6952_v24, %v6951_v43  ;;  %v1919_v3 = vcombine.high %v5666_v39, %v5752_v29 }
 0x160   : > { %v5820_v33 = vrot.slane %v1982_v60, %v4744_v23  ;;  %v5850_v60 = vrot.slane %v2055_v54, %v4708_v11  ;;  %v2311_v51 = vcombine.high %v5778_v49, %v2271_v28  ;;  %v2479_v46 = vcombine.high %v6954_v44, %v6953_v5 }
 0x161   : > { %v2275_v31 = vpop.permute.xlu1 %2274  ;;  %v2279_v34 = vpop.permute.xlu0 %2278  ;;  %v5866_v53 = vrot.slane %v1903_v57, %v4708_v11  ;;  %v1983_v39 = vcombine.high %v5793_v17, %v5796_v62  ;;  %v2318_v29 = vrot.slane %v2310_v0, %v4708_v11  ;;  %v1951_v54 = vcombine.high %v5772_v9, %v5765_v47 }
 0x162   : > { %6944 = vst [vmem:[#allocation27_spill] sm:$0xff] %v5820_v33  ;;  %v2326_v1 = vcombine.low %v2267_v38, %v2275_v31  ;;  %v2327_v12 = vcombine.high %v2267_v38, %v2275_v31  ;;  %v5869_v38 = vrot.slane %v1887_v42, %v4708_v11  ;;  %v5872_v31 = vrot.slane %v1935_v22, %v4708_v11 }
 0x163   : > { %v5885_v57 = vrot.slane %v1919_v3, %v4708_v11  ;;  %v5888_v42 = vrot.slane %v2311_v51, %v4708_v11  ;;  %v5905_v30 = vrot.slane %v1983_v39, %v4744_v23  ;;  %v2135_v32 = vcombine.high %v5850_v60, %v5843_v59 }
 0x164   : > { %v2334_v4 = vrot.slane %v2326_v1, %v4708_v11  ;;  %v5882_v37 = vrot.slane %v2327_v12, %v4708_v11  ;;  %v1966_v5 = vcombine.low %v5869_v38, %v5866_v53 }
 0x165   : > { %v2283_v26 = vpop.permute.xlu1 %2282  ;;  %v2287_v25 = vpop.permute.xlu0 %2286  ;;  %v1998_v45 = vcombine.low %v5885_v57, %v5872_v31 }
 0x166   : > { %v2342_v36 = vcombine.low %v2279_v34, %v2287_v25  ;;  %v2343_v10 = vcombine.high %v2279_v34, %v2287_v25  ;;  %v2374_v17 = vcombine.low %v2318_v29, %v2334_v4  ;;  %v2375_v62 = vcombine.high %v2318_v29, %v2334_v4 }
 0x167   : > { %v5902_v25 = vrot.slane %v2495_v58, %v4708_v11  ;;  %v2390_v24 = vcombine.low %v5888_v42, %v5882_v37  ;;  %v5918_v58 = vrot.slane %v2479_v46, %v4708_v11  ;;  %v5921_v4 = vrot.slane %v1951_v54, %v4744_v23 }
 0x168   : > { %v2350_v22 = vrot.slane %v2342_v36, %v4708_v11  ;;  %v5892_v0 = vrot.slane %v2343_v10, %v4708_v11  ;;  %v5926_v44 = vrot.slane %v2374_v17, %v4744_v23  ;;  %v5929_v36 = vrot.slane %v2375_v62, %v4744_v23 }
 0x169   : > { %v2291_v49 = vpop.permute.xlu1 %2290  ;;  %v5877_v28 = vpop.permute.xlu0 %3048  ;;  %v2102_v29 = vcombine.low %v5836_v40, %v5833_v52  ;;  %v2134_v54 = vcombine.low %v5850_v60, %v5843_v59  ;;  %v5954_v62 = vrot.slane %v2390_v24, %v4744_v23 }
 0x16a   : > { %v2358_v34 = vcombine.low %v2283_v26, %v2291_v49  ;;  %v2359_v1 = vcombine.high %v2283_v26, %v2291_v49  ;;  %v5899_v26 = vrot.slane %v2447_v27, %v4708_v11  ;;  %6955 = vst [vmem:[#allocation32_spill] sm:$0xff] %v5926_v44  ;;  %v2103_v49 = vcombine.high %v5836_v40, %v5833_v52 }
 0x16c   : > { %v2366_v47 = vrot.slane %v2358_v34, %v4708_v11  ;;  %v5896_v9 = vrot.slane %v2359_v1, %v4708_v11  ;;  %v5947_v34 = vrot.slane %v1998_v45, %v4744_v23  ;;  %v2526_v40 = vcombine.low %v5899_v26, %v5853_v21 }
 0x16d   : > { %v5909_v12 = vpop.permute.xlu1 %3052  ;;  %v5911_v43 = vpop.permute.xlu0 %3056  ;;  %v2558_v45 = vcombine.low %v5918_v58, %v5902_v25  ;;  %v6002_v8 = vrot.slane %v2103_v49, %v4744_v23 }
 0x16e   : > { %v2406_v3 = vcombine.low %v2350_v22, %v2366_v47  ;;  %v2407_v51 = vcombine.high %v2350_v22, %v2366_v47  ;;  %v2422_v27 = vcombine.low %v5892_v0, %v5896_v9  ;;  %v2017_v47 = vcombine.high %v5921_v4, %v5905_v30 }
 0x16f   : > { %v3230_v59 = vcombine.low %v5877_v28, %v5911_v43 }
 0x170   : > { %v5932_v10 = vrot.slane %v2406_v3, %v4744_v23  ;;  %v5935_v39 = vrot.slane %v2407_v51, %v4744_v23  ;;  %v5938_v46 = vrot.slane %v2422_v27, %v4744_v23  ;;  %v2015_v3 = vcombine.high %v5817_v63, %v5820_v33 }
 0x171   : > { %v5949_v1 = vpop.permute.xlu1 %3060  ;;  %v5951_v17 = vpop.permute.xlu0 %3064  ;;  %v5971_v51 = vrot.slane %v1966_v5, %v4744_v23  ;;  %v6957_v63 = vcombine.low %v5801_v18, %v5812_v7  ;;  %v6958_v5 = vcombine.low %v5806_v35, %v5809_v20 }
 0x172   : > { %6956 = vst [vmem:[#allocation30_spill] sm:$0xff] %v5932_v10  ;;  %v2441_v52 = vcombine.high %v5929_v36, %v5935_v39  ;;  %v2439_v24 = vcombine.high %v5926_v44, %v5932_v10  ;;  %v3246_v27 = vcombine.low %v5909_v12, %v5949_v1  ;;  %v2442_v22 = vcombine.low %v5954_v62, %v5938_v46 }
 0x173   : > { %v4329_v10 = vpack.i.bf16 %v6958_v5, %v6957_v63  ;;  %v2018_v60 = vcombine.low %v5971_v51, %v5947_v34  ;;  %v6005_v63 = vrot.slane %v2134_v54, %v4744_v23  ;;  %v6022_v5 = vrot.slane %v2135_v32, %v4744_v23 }
 0x174   : > { %v4354_v19 = vpack.i.bf16 %v2441_v52, %v2017_v47  ;;  %v4319_v33 = vpack.i.bf16 %v2439_v24, %v2015_v3  ;;  %v1597_v47 = vcombine.high %v5806_v35, %v5809_v20  ;;  %v5992_v52 = vrot.slane %v2102_v29, %v4744_v23  ;;  %v6959_v3 = vld [vmem:[#allocation53_spill] sm:$0xff]  ;;  %v6960_v24 = vld [vmem:[#allocation52_spill] sm:$0xff] }
 0x175   : > { %v5979_v61 = vpop.permute.xlu1 %3068  ;;  %v5981_v55 = vpop.permute.xlu0 %3072  ;;  %v2870_v44 = vcombine.low %v6960_v24, %v6959_v3  ;;  %v6008_v35 = vrot.slane %v2526_v40, %v4744_v23  ;;  %v1237_v20 = vcombine.high %v5801_v18, %v5812_v7  ;;  %v6017_v29 = vrot.slane %v3246_v27, %v4708_v11  ;;  %v4509_v3 = vld [vmem:[%s4697_s30 + $0x1a] ss:$48 sps:$4 sm:$0xff]   ;;  %v4511_v24 = vld [vmem:[%s4697_s30 + $0x62] ss:$48 sps:$4 sm:$0xff]  }
 0x176   : > { %4355 = vrot.lane.b32.xlu1 %v4354_v19, %s4606_s5  ;;  %4320 = vrot.lane.b32.xlu0 %v4319_v33, %s4607_s6  ;;  %v6014_v19 = vrot.slane %v2558_v45, %v4744_v23  ;;  %v3262_v49 = vcombine.low %v5951_v17, %v5981_v55  ;;  %v4364_v54 = vpack.i.bf16 %v2442_v22, %v2018_v60  ;;  %v4507_v60 = vld [vmem:[%s4697_s30 + $0x2] ss:$48 sps:$4 sm:$0xff]  }
 0x177   : > { %v2527_v33 = vcombine.high %v5899_v26, %v5853_v21  ;;  %v2559_v18 = vcombine.high %v5918_v58, %v5902_v25  ;;  %v2440_v45 = vcombine.low %v5929_v36, %v5935_v39  ;;  %v3238_v22 = vrot.slane %v3230_v59, %v4708_v11  ;;  %v6962_v26 = vld [vmem:[#allocation55_spill] sm:$0xff]  ;;  %v6963_v25 = vld [vmem:[#allocation56_spill] sm:$0xff] }
 0x178   : > { %v6039_v21 = vrot.slane %v2870_v44, %v4744_v23  ;;  %v6964_v58 = vcombine.low %v6962_v26, %v6963_v25  ;;  %v2016_v36 = vcombine.low %v5921_v4, %v5905_v30  ;;  %v4349_v39 = vpack.i.bf16 %v1597_v47, %v1237_v20 }
 0x179   : > { %v6028_v7 = vpop.permute.xlu1 %3076  ;;  %v6030_v40 = vpop.permute.xlu0 %3046  ;;  %v2154_v59 = vcombine.low %v5992_v52, %v6005_v63  ;;  %v2155_v44 = vcombine.high %v5992_v52, %v6005_v63  ;;  %v3294_v26 = vcombine.low %v3238_v22, %v6017_v29  ;;  %v3270_v25 = vrot.slane %v3262_v49, %v4708_v11 }
 0x17a   : > { %v3278_v32 = vcombine.low %v5979_v61, %v6028_v7  ;;  %4365 = vrot.lane.b32.xlu1 %v4364_v54, %s4609_s8  ;;  %6961 = vst [vmem:[#allocation34_spill] sm:$0xff] %v6039_v21  ;;  %v6045_v27 = vrot.slane %v6964_v58, %v4744_v23  ;;  %4330 = vrot.lane.b32.xlu0 %v4329_v10, %s4611_s10  ;;  %v4513_v54 = vld [vmem:[%s4697_s30 + $0x7a] ss:$48 sps:$4 sm:$0xff]  }
 0x17b   : > { %v2578_v30 = vcombine.low %v6008_v35, %v6014_v19  ;;  %v2541_v4 = vrot.slane %v2527_v33, %v4744_v23  ;;  %v2573_v47 = vrot.slane %v2559_v18, %v4744_v23  ;;  %v4339_v52 = vpack.i.bf16 %v2440_v45, %v2016_v36 }
 0x17c   : > { %6965 = vst [vmem:[#allocation35_spill] sm:$0xff] %v6045_v27  ;;  %v3286_v10 = vrot.slane %v3278_v32, %v4708_v11  ;;  %v2156_v63 = vcombine.low %v6002_v8, %v6022_v5  ;;  %v2935_v32 = vcombine.high %v6039_v21, %v6045_v27  ;;  %v2157_v13 = vcombine.high %v6002_v8, %v6022_v5 }
 0x17d   : > { %v6065_v20 = vpop.permute.xlu1 %3050  ;;  %v6067_v58 = vpop.permute.xlu0 %3054  ;;  %v2678_v33 = vrot.slane %v4507_v60, %v4708_v11  ;;  %v2694_v45 = vrot.slane %v4509_v3, %v4708_v11  ;;  %v2710_v36 = vrot.slane %v4511_v24, %v4708_v11  ;;  %v2726_v6 = vrot.slane %v4513_v54, %v4708_v11 }
 0x17e   : > { %v3326_v49 = vcombine.low %v3270_v25, %v3286_v10  ;;  %v3327_v18 = vcombine.high %v3270_v25, %v3286_v10  ;;  %4340 = vrot.lane.b32.xlu0 %v4339_v52, %s4608_s7  ;;  %v6083_v56 = vrot.slane %v3294_v26, %v4744_v23  ;;  %v4359_v8 = vpack.i.bf16 %v2578_v30, %v2154_v59  ;;  %v4517_v26 = vld [vmem:[%s4697_s30 + $0x66] ss:$48 sps:$4 sm:$0xff]   ;;  %v4518_v52 = vld [vmem:[%s4697_s30 + $0x7e] ss:$48 sps:$4 sm:$0xff]   ;;  %s212_s30 = scalar_lea.vmem [#allocation3], %s4095_s28 }
 0x17f   : > { %v2579_v5 = vcombine.high %v6008_v35, %v6014_v19  ;;  %v3295_v60 = vcombine.high %v3238_v22, %v6017_v29  ;;  %v2580_v3 = vcombine.low %v2541_v4, %v2573_v47  ;;  %v6096_v24 = vrot.slane %v4515_v2, %v4708_v11  ;;  %s3983_s4 = sshll.u32 %s212_s30, 4  ;;  %s6686_s4 = int_to_ptr.vmem [resolvable:$true] %s3983_s4 }
 0x180   : > { %v6086_v21 = vrot.slane %v3326_v49, %v4744_v23  ;;  %v6099_v54 = vrot.slane %v4516_v15, %v4708_v11  ;;  %v1967_v59 = vcombine.high %v5869_v38, %v5866_v53  ;;  %v2581_v29 = vcombine.high %v2541_v4, %v2573_v47  ;;  %s4523_s15 = scalar_lea.vmem %s6686_s4, 256 }
 0x181   : > { %v6091_v25 = vpop.permute.xlu1 %3058  ;;  %v6093_v10 = vpop.permute.xlu0 %3062  ;;  %v6110_v22 = vrot.slane %v3327_v18, %v4744_v23  ;;  %v2734_v2 = vcombine.low %v2678_v33, %v2694_v45  ;;  %v2766_v15 = vcombine.low %v2710_v36, %v2726_v6  ;;  %v2735_v30 = vcombine.high %v2678_v33, %v2694_v45  ;;  %p4524_p12 = scmp.ne.s32.totalorder %s6686_s4, %s4523_s15 }
 0x182   : > { %6966 = vst [vmem:[#allocation36_spill] sm:$0xff] %v6086_v21  ;;  %v3359_v19 = vcombine.high %v6083_v56, %v6086_v21  ;;  %4350 = vrot.lane.b32.xlu0 %v4349_v39, %s4612_s11  ;;  %v3110_v49 = vcombine.low %v6065_v20, %v6091_v25  ;;  %v4369_v53 = vpack.i.bf16 %v2579_v5, %v2155_v44 }
 0x183   : > { %v2767_v38 = vcombine.high %v2710_v36, %v2726_v6  ;;  %v6116_v35 = vrot.slane %v3295_v60, %v4744_v23  ;;  %v6119_v4 = vrot.slane %v4517_v26, %v4708_v11  ;;  %v6122_v47 = vrot.slane %v4518_v52, %v4708_v11  ;;  %p4525_p13 = pnand %p4524_p12, %p4677_p4 }
 0x184   : > { %v4374_v27 = vpack.i.bf16 %v3359_v19, %v2935_v32  ;;  %v2750_v39 = vcombine.low %v6096_v24, %v6099_v54  ;;  %v6127_v33 = vrot.slane %v1967_v59, %v4744_v23  ;;  %v3094_v6 = vcombine.low %v6030_v40, %v6067_v58 }
 0x185   : > { %v3067_v48 = vpop.permute.xlu1 %3066  ;;  %v3071_v21 = vpop.permute.xlu0 %3070  ;;  %v4384_v44 = vpack.i.bf16 %v2580_v3, %v2156_v63  ;;  %v4404_v32 = vpack.i.bf16 %v2581_v29, %v2157_v13  ;;  %v3360_v18 = vcombine.low %v6116_v35, %v6110_v22  ;;  %v6136_v45 = vrot.slane %v2734_v2, %v4744_v23  ;;  %p4526_p0 = pneg %p4525_p13 }
 0x186   : > { %4375 = vrot.lane.b32.xlu1 %v4374_v27, %s4607_s6  ;;  %4360 = vrot.lane.b32.xlu0 %v4359_v8, %s4609_s8  ;;  %v6139_v36 = vrot.slane %v2766_v15, %v4744_v23  ;;  %v6142_v5 = vrot.slane %v2735_v30, %v4744_v23  ;;  %v3118_v60 = vrot.slane %v3110_v49, %v4708_v11 }
 0x187   : > { %v3126_v27 = vcombine.low %v6093_v10, %v3071_v21  ;;  %v6147_v13 = vrot.slane %v2767_v38, %v4744_v23  ;;  %v2751_v63 = vcombine.high %v6096_v24, %v6099_v54  ;;  %v3111_v8 = vcombine.high %v6065_v20, %v6091_v25  ;;  %v6968_v25 = vld [vmem:[#allocation62_spill] sm:$0xff] }
 0x188   : > { %v2443_v52 = vcombine.high %v5954_v62, %v5938_v46  ;;  %v6158_v59 = vrot.slane %v2750_v39, %v4744_v23  ;;  %v2782_v19 = vcombine.low %v6119_v4, %v6122_v47  ;;  %v3102_v29 = vrot.slane %v3094_v6, %v4708_v11  ;;  %v6967_v62 = vld [vmem:[#allocation61_spill] sm:$0xff] }
 0x189   : > { %v3075_v3 = vpop.permute.xlu1 %3074  ;;  %v6153_v26 = vpop.permute.xlu0 %3472  ;;  %v3127_v2 = vcombine.high %v6093_v10, %v3071_v21  ;;  %v3095_v20 = vcombine.high %v6030_v40, %v6067_v58  ;;  %v2019_v46 = vcombine.high %v5971_v51, %v5947_v34  ;;  %v6969_v49 = vcombine.low %v6967_v62, %v6968_v25 }
 0x18a   : > { %v3142_v15 = vcombine.low %v3067_v48, %v3075_v3  ;;  %v3143_v30 = vcombine.high %v3067_v48, %v3075_v3  ;;  %4385 = vrot.lane.b32.xlu1 %v4384_v44, %s4611_s10  ;;  %4370 = vrot.lane.b32.xlu0 %v4369_v53, %s4610_s9  ;;  %v2799_v39 = vcombine.high %v6136_v45, %v6139_v36 }
 0x18b   : > { %v4394_v38 = vpack.i.bf16 %v3360_v18, %v6969_v49  ;;  %v3158_v21 = vcombine.low %v3102_v29, %v3118_v60  ;;  %v3134_v48 = vrot.slane %v3126_v27, %v4708_v11  ;;  %v1999_v40 = vcombine.high %v5885_v57, %v5872_v31 }
 0x18c   : > { %v3150_v10 = vrot.slane %v3142_v15, %v4708_v11  ;;  %v6178_v6 = vrot.slane %v3143_v30, %v4708_v11  ;;  %v2423_v34 = vcombine.high %v5892_v0, %v5896_v9  ;;  %v6185_v51 = vrot.slane %v3111_v8, %v4708_v11 }
 0x18d   : > { %v6187_v58 = vpop.permute.xlu1 %3476  ;;  %v6189_v53 = vpop.permute.xlu0 %3480  ;;  %v4379_v44 = vpack.i.bf16 %v2443_v52, %v2019_v46  ;;  %v3159_v18 = vcombine.high %v3102_v29, %v3118_v60  ;;  %v6192_v27 = vrot.slane %v3127_v2, %v4708_v11  ;;  %v2391_v31 = vcombine.high %v5888_v42, %v5882_v37 }
 0x18e   : > { %v3190_v3 = vcombine.low %v3134_v48, %v3150_v10  ;;  %v3191_v15 = vcombine.high %v3134_v48, %v3150_v10  ;;  %4395 = vrot.lane.b32.xlu1 %v4394_v38, %s4608_s7  ;;  %v6198_v57 = vrot.slane %v3095_v20, %v4708_v11  ;;  %v3361_v0 = vcombine.high %v6116_v35, %v6110_v22 }
 0x18f   : > { %4380 = vrot.lane.b32.xlu0 %v4379_v44, %s4610_s9  ;;  %v2801_v9 = vcombine.high %v6142_v5, %v6147_v13  ;;  %v6206_v60 = vrot.slane %v3158_v21, %v4744_v23  ;;  %v3206_v37 = vcombine.low %v6192_v27, %v6178_v6  ;;  %v6217_v42 = vrot.slane %v1999_v40, %v4744_v23 }
 0x190   : > { %v6209_v8 = vrot.slane %v3190_v3, %v4744_v23  ;;  %v6212_v52 = vrot.slane %v3191_v15, %v4744_v23  ;;  %v6220_v35 = vrot.slane %v2423_v34, %v4744_v23  ;;  %v3279_v22 = vcombine.high %v5979_v61, %v6028_v7 }
 0x191   : > { %v6224_v29 = vpop.permute.xlu1 %3484  ;;  %v6226_v2 = vpop.permute.xlu0 %3488  ;;  %v6229_v30 = vrot.slane %v2782_v19, %v4744_v23  ;;  %v3173_v20 = vrot.slane %v3159_v18, %v4744_v23  ;;  %v3174_v46 = vcombine.low %v6198_v57, %v6185_v51  ;;  %v6240_v7 = vrot.slane %v2391_v31, %v4744_v23 }
 0x192   : > { %v3222_v49 = vcombine.low %v6206_v60, %v6209_v8  ;;  %4405 = vrot.lane.b32.xlu1 %v4404_v32, %s4612_s11  ;;  %v3223_v61 = vcombine.high %v6206_v60, %v6209_v8  ;;  %v3231_v19 = vcombine.high %v5877_v28, %v5911_v43  ;;  %v3247_v38 = vcombine.high %v5909_v12, %v5949_v1 }
 0x193   : > { %v3263_v21 = vcombine.high %v5951_v17, %v5981_v55  ;;  %v3214_v48 = vrot.slane %v3206_v37, %v4744_v23  ;;  %v6970_v32 = vcombine.high %v6967_v62, %v6968_v25  ;;  %v3225_v34 = vcombine.high %v3173_v20, %v6212_v52 }
 0x194   : > { %v4389_v40 = vpack.i.bf16 %v3223_v61, %v2799_v39  ;;  %v6254_v44 = vrot.slane %v3279_v22, %v4708_v11  ;;  %v2444_v12 = vcombine.low %v6240_v7, %v6220_v35  ;;  %v2800_v55 = vcombine.low %v6142_v5, %v6147_v13 }
 0x195   : > { %v4414_v10 = vpack.i.bf16 %v3361_v0, %v6970_v32  ;;  %v6256_v18 = vpop.permute.xlu1 %3492  ;;  %v6258_v28 = vpop.permute.xlu0 %3496  ;;  %v2783_v43 = vcombine.high %v6119_v4, %v6122_v47  ;;  %v3182_v1 = vrot.slane %v3174_v46, %v4744_v23  ;;  %v3654_v17 = vcombine.low %v6153_v26, %v6189_v53 }
 0x196   : > { %v3670_v62 = vcombine.low %v6187_v58, %v6224_v29  ;;  %v2802_v25 = vcombine.low %v6158_v59, %v6229_v30  ;;  %v6275_v39 = vrot.slane %v3247_v38, %v4708_v11  ;;  %v3277_v5 = vrot.slane %v3263_v21, %v4708_v11  ;;  %4390 = vrot.lane.b32.xlu0 %v4389_v40, %s4607_s6 }
 0x197   : > { %4415 = vrot.lane.b32.xlu1 %v4414_v10, %s4606_s5  ;;  %v3686_v4 = vcombine.low %v6226_v2, %v6258_v28  ;;  %v2020_v47 = vcombine.low %v6127_v33, %v6217_v42  ;;  %v3245_v13 = vrot.slane %v3231_v19, %v4708_v11  ;;  %v3207_v3 = vcombine.high %v6192_v27, %v6178_v6 }
 0x198   : > { %v4424_v15 = vpack.i.bf16 %v3225_v34, %v2801_v9  ;;  %v3226_v31 = vcombine.low %v3182_v1, %v3214_v48  ;;  %v3342_v0 = vcombine.low %v3277_v5, %v6254_v44  ;;  %v3175_v37 = vcombine.high %v6198_v57, %v6185_v51 }
 0x199   : > { %v6289_v22 = vpop.permute.xlu1 %3500  ;;  %v6291_v46 = vpop.permute.xlu0 %3470  ;;  %v4399_v61 = vpack.i.bf16 %v2444_v12, %v2020_v47  ;;  %v3224_v38 = vcombine.low %v3173_v20, %v6212_v52  ;;  %v6295_v21 = vrot.slane %v3654_v17, %v4708_v11  ;;  %v6298_v19 = vrot.slane %v3670_v62, %v4708_v11 }
 0x19a   : > { %v6301_v6 = vrot.slane %v3686_v4, %v4708_v11  ;;  %v3702_v27 = vcombine.low %v6256_v18, %v6289_v22  ;;  %v3310_v51 = vcombine.low %v3245_v13, %v6275_v39  ;;  %v2803_v57 = vcombine.high %v6158_v59, %v6229_v30 }
 0x19b   : > { %4425 = vrot.lane.b32.xlu1 %v4424_v15, %s4606_s5  ;;  %4400 = vrot.lane.b32.xlu0 %v4399_v61, %s4611_s10  ;;  %v6314_v9 = vrot.slane %v2751_v63, %v4744_v23  ;;  %v6317_v52 = vrot.slane %v2783_v43, %v4744_v23  ;;  %v6320_v20 = vrot.slane %v3207_v3, %v4744_v23 }
 0x19c   : > { %v6323_v32 = vrot.slane %v3702_v27, %v4708_v11  ;;  %v4434_v10 = vpack.i.bf16 %v3226_v31, %v2802_v25  ;;  %v3227_v40 = vcombine.high %v3182_v1, %v3214_v48  ;;  %v3350_v34 = vrot.slane %v3342_v0, %v4744_v23 }
 0x19d   : > { %v6326_v59 = vpop.permute.xlu1 %3474  ;;  %v6328_v30 = vpop.permute.xlu0 %3478  ;;  %v4409_v24 = vpack.i.bf16 %v3224_v38, %v2800_v55  ;;  %v2445_v54 = vcombine.high %v6240_v7, %v6220_v35  ;;  %v6333_v63 = vrot.slane %v3175_v37, %v4744_v23  ;;  %v3718_v12 = vcombine.low %v6295_v21, %v6298_v19 }
 0x19e   : > { %v3750_v43 = vcombine.low %v6301_v6, %v6323_v32  ;;  %v3318_v48 = vrot.slane %v3310_v51, %v4744_v23  ;;  %v2021_v55 = vcombine.high %v6127_v33, %v6217_v42  ;;  %v2804_v35 = vcombine.low %v6314_v9, %v6317_v52 }
 0x19f   : > { %4435 = vrot.lane.b32.xlu1 %v4434_v10, %s4609_s8  ;;  %4410 = vrot.lane.b32.xlu0 %v4409_v24, %s4608_s7  ;;  %v3343_v7 = vcombine.high %v3277_v5, %v6254_v44  ;;  %v4444_v17 = vpack.i.bf16 %v3227_v40, %v2803_v57  ;;  %v3228_v62 = vcombine.low %v6333_v63, %v6320_v20 }
 0x1a0   : > { %v6348_v1 = vrot.slane %v3750_v43, %v4744_v23  ;;  %v4419_v47 = vpack.i.bf16 %v2445_v54, %v2021_v55  ;;  %v3362_v3 = vcombine.low %v3318_v48, %v3350_v34  ;;  %v6355_v15 = vrot.slane %v3718_v12, %v4744_v23 }
 0x1a1   : > { %v6352_v25 = vpop.permute.xlu1 %3482  ;;  %v3487_v4 = vpop.permute.xlu0 %3486  ;;  %v3311_v33 = vcombine.high %v3245_v13, %v6275_v39  ;;  %v3357_v42 = vrot.slane %v3343_v7, %v4744_v23  ;;  %v4454_v44 = vpack.i.bf16 %v3228_v62, %v2804_v35  ;;  %v3518_v31 = vcombine.low %v6291_v46, %v6328_v30 }
 0x1a2   : > { %v3782_v5 = vcombine.low %v6355_v15, %v6348_v1  ;;  %v3534_v0 = vcombine.low %v6326_v59, %v6352_v25  ;;  %v6971_v38 = vcombine.low %v5457_v41, %v5469_v50  ;;  %v3363_v13 = vcombine.high %v3318_v48, %v3350_v34 }
 0x1a3   : > { %4445 = vrot.lane.b32.xlu1 %v4444_v17, %s4610_s9  ;;  %4420 = vrot.lane.b32.xlu0 %v4419_v47, %s4612_s11  ;;  %v3325_v27 = vrot.slane %v3311_v33, %v4744_v23  ;;  %v3783_v57 = vcombine.high %v6355_v15, %v6348_v1  ;;  %v3526_v10 = vrot.slane %v3518_v31, %v4708_v11 }
 0x1a4   : > { %v4429_v39 = vpack.i.bf16 %v3362_v3, %v6971_v38  ;;  %v3542_v40 = vrot.slane %v3534_v0, %v4708_v11  ;;  %v6972_v54 = vcombine.high %v5457_v41, %v5469_v50  ;;  %v6973_v50 = vcombine.low %v5464_v16, %v5472_v14 }
 0x1a5   : > { %v3491_v37 = vpop.permute.xlu1 %3490  ;;  %v3495_v61 = vpop.permute.xlu0 %3494  ;;  %v3364_v34 = vcombine.low %v3325_v27, %v3357_v42  ;;  %v3365_v55 = vcombine.high %v3325_v27, %v3357_v42  ;;  %v2805_v47 = vcombine.high %v6314_v9, %v6317_v52  ;;  %v3687_v3 = vcombine.high %v6226_v2, %v6258_v28 }
 0x1a6   : > { %v3550_v51 = vcombine.low %v3487_v4, %v3495_v61  ;;  %v4439_v12 = vpack.i.bf16 %v3363_v13, %v6972_v54  ;;  %v3582_v17 = vcombine.low %v3526_v10, %v3542_v40  ;;  %v6974_v42 = vcombine.high %v5464_v16, %v5472_v14 }
 0x1a7   : > { %4455 = vrot.lane.b32.xlu1 %v4454_v44, %s4611_s10  ;;  %4430 = vrot.lane.b32.xlu0 %v4429_v39, %s4609_s8  ;;  %v4449_v41 = vpack.i.bf16 %v3364_v34, %v6973_v50  ;;  %v3229_v31 = vcombine.high %v6333_v63, %v6320_v20  ;;  %v3551_v0 = vcombine.high %v3487_v4, %v3495_v61  ;;  %v6975_v63 = vld [vmem:[#allocation42_spill] sm:$0xff]  ;;  %v6976_v4 = vld [vmem:[#allocation43_spill] sm:$0xff] }
 0x1a8   : > { %v3558_v43 = vrot.slane %v3550_v51, %v4708_v11  ;;  %v4459_v44 = vpack.i.bf16 %v3365_v55, %v6974_v42  ;;  %v3703_v9 = vcombine.high %v6256_v18, %v6289_v22  ;;  %v3751_v2 = vcombine.high %v6301_v6, %v6323_v32 }
 0x1a9   : > { %v3499_v24 = vpop.permute.xlu1 %3498  ;;  %v6382_v35 = vpop.permute.xlu0 %4260  ;;  %v3519_v16 = vcombine.high %v6291_v46, %v6328_v30  ;;  %v3535_v28 = vcombine.high %v6326_v59, %v6352_v25  ;;  %v3583_v52 = vcombine.high %v3526_v10, %v3542_v40  ;;  %v6414_v20 = vrot.slane %v3582_v17, %v4744_v23 }
 0x1aa   : > { %v3566_v48 = vcombine.low %v3491_v37, %v3499_v24  ;;  %v3567_v38 = vcombine.high %v3491_v37, %v3499_v24  ;;  %v6977_v37 = vcombine.low %v6975_v63, %v6976_v4  ;;  %v3655_v46 = vcombine.high %v6153_v26, %v6189_v53 }
 0x1ab   : > { %3819 = vrot.lane.b32.xlu1 %v3783_v57, %s4607_s6  ;;  %4440 = vrot.lane.b32.xlu0 %v4439_v12, %s4610_s9  ;;  %v3671_v32 = vcombine.high %v6187_v58, %v6224_v29  ;;  %v3719_v59 = vcombine.high %v6295_v21, %v6298_v19  ;;  %v3565_v30 = vrot.slane %v3551_v0, %v4708_v11 }
 0x1ac   : > { %v3574_v7 = vrot.slane %v3566_v48, %v4708_v11  ;;  %v3581_v25 = vrot.slane %v3567_v38, %v4708_v11  ;;  %v3701_v51 = vrot.slane %v3687_v3, %v4708_v11  ;;  %v3717_v26 = vrot.slane %v3703_v9, %v4708_v11 }
 0x1ad   : > { %v6386_v62 = vpop.permute.xlu1 %4265  ;;  %v6422_v22 = vpop.permute.xlu0 %4270  ;;  %v3765_v58 = vrot.slane %v3751_v2, %v4744_v23  ;;  %v4464_v53 = vpack.i.bf16 %v3229_v31, %v2805_v47  ;;  %v3533_v29 = vrot.slane %v3519_v16, %v4708_v11  ;;  %v3549_v21 = vrot.slane %v3535_v28, %v4708_v11  ;;  %v6978_v28 = vld [vmem:[#allocation57_spill] sm:$0xff] }
 0x1ae   : > { %v3614_v33 = vcombine.low %v3558_v43, %v3574_v7  ;;  %v3615_v39 = vcombine.high %v3558_v43, %v3574_v7  ;;  %v4267_v13 = vunpack.i.l.bf16 %v6386_v62  ;;  %v3597_v19 = vrot.slane %v3583_v52, %v4744_v23  ;;  %v6979_v52 = vld [vmem:[#allocation58_spill] sm:$0xff] }
 0x1af   : > { %4450 = vrot.lane.b32.xlu0 %v4449_v41, %s4611_s10  ;;  %v3669_v40 = vrot.slane %v3655_v46, %v4708_v11  ;;  %v3685_v24 = vrot.slane %v3671_v32, %v4708_v11  ;;  %v3733_v54 = vrot.slane %v3719_v59, %v4744_v23  ;;  %v3630_v12 = vcombine.low %v3565_v30, %v3581_v25  ;;  %v6982_v46 = vld [vmem:[#allocation66_spill] sm:$0xff] }
 0x1b0   : > { %v6409_v14 = vrot.slane %v3614_v33, %v4744_v23  ;;  %v6420_v18 = vsel %vm575_vm0, %v6977_v37, %v4267_v13  ;;  %v3629_v61 = vrot.slane %v3615_v39, %v4744_v23  ;;  %v3766_v48 = vcombine.low %v3701_v51, %v3717_v26  ;;  %v6981_v37 = vld [vmem:[#allocation65_spill] sm:$0xff] }
 0x1b1   : > { %v6424_v6 = vpop.permute.xlu1 %4275  ;;  %v6452_v34 = vpop.permute.xlu0 %4280  ;;  %v3598_v55 = vcombine.low %v3533_v29, %v3549_v21  ;;  %v3784_v17 = vcombine.low %v3733_v54, %v3765_v58  ;;  %v3734_v50 = vcombine.low %v3669_v40, %v3685_v24  ;;  %v3638_v41 = vrot.slane %v3630_v12, %v4744_v23 }
 0x1b2   : > { %v3647_v27 = vcombine.high %v6414_v20, %v6409_v14  ;;  %v3646_v10 = vcombine.low %v6414_v20, %v6409_v14  ;;  %v3648_v43 = vcombine.low %v3597_v19, %v3629_v61  ;;  %v3649_v11 = vcombine.high %v3597_v19, %v3629_v61  ;;  %v6984_v61 = vld [vmem:[#allocation68_spill] sm:$0xff] }
 0x1b3   : > { %4460 = vrot.lane.b32.xlu0 %v4459_v44, %s4612_s11  ;;  %v3774_v47 = vrot.slane %v3766_v48, %v4744_v23  ;;  %v3606_v3 = vrot.slane %v3598_v55, %v4744_v23  ;;  %v3785_v44 = vcombine.high %v3733_v54, %v3765_v58  ;;  %v3735_v31 = vcombine.high %v3669_v40, %v3685_v24 }
 0x1b4   : > { %3791 = vrot.lane.b32.xlu1 %v3647_v27, %s4607_s6  ;;  %v3767_v0 = vcombine.high %v3701_v51, %v3717_v26  ;;  %v3742_v13 = vrot.slane %v3734_v50, %v4744_v23  ;;  %v3631_v9 = vcombine.high %v3565_v30, %v3581_v25  ;;  %v3599_v16 = vcombine.high %v3533_v29, %v3549_v21  ;;  %v6985_v27 = vld [vmem:[#allocation67_spill] sm:$0xff]  ;;  %v6987_v50 = vld [vmem:[#allocation29_spill] sm:$0xff] }
 0x1b5   : > { %v6445_v57 = vpop.permute.xlu1 %4285  ;;  %v4291_v33 = vpop.permute.xlu0 %4290  ;;  %v3650_v2 = vcombine.low %v3606_v3, %v3638_v41  ;;  %v6980_v63 = vcombine.low %v6978_v28, %v6979_v52  ;;  %v6983_v32 = vcombine.low %v6981_v37, %v6982_v46  ;;  %v1726_v51 = vcombine.low %v6985_v27, %v6984_v61 }
 0x1b6   : > { %v4262_v30 = vunpack.i.l.bf16 %v6382_v35  ;;  %v3786_v26 = vcombine.low %v3742_v13, %v3774_v47  ;;  %v3749_v58 = vrot.slane %v3735_v31, %v4744_v23  ;;  %v4263_v29 = vunpack.i.h.bf16 %v6382_v35 }
 0x1b7   : > { %4465 = vrot.lane.b32.xlu0 %v4464_v53, %s4612_s11  ;;  %v3781_v53 = vrot.slane %v3767_v0, %v4744_v23  ;;  %v4272_v21 = vunpack.i.l.bf16 %v6422_v22  ;;  %v3645_v19 = vrot.slane %v3631_v9, %v4744_v23  ;;  %v4273_v40 = vunpack.i.h.bf16 %v6422_v22 }
 0x1b8   : > { %3795 = vrot.lane.b32.xlu1 %v3648_v43, %s4608_s7  ;;  %v3651_v54 = vcombine.high %v3606_v3, %v3638_v41  ;;  %v3787_v12 = vcombine.high %v3742_v13, %v3774_v47  ;;  %v3613_v43 = vrot.slane %v3599_v16, %v4744_v23  ;;  %v4283_v48 = vunpack.i.h.bf16 %v6452_v34 }
 0x1b9   : > { %v6456_v7 = vpop.permute.xlu1 %4295  ;;  %v4301_v24 = vpop.permute.xlu0 %4300  ;;  %v4282_v55 = vunpack.i.l.bf16 %v6452_v34  ;;  %v4614_v31 = vmov 0.0   ;;  %v1797_v41 = vsel %vm575_vm0, %v1726_v51, %v4263_v29  ;;  %v4615_v34 = vmov 0  }
 0x1ba   : > { %3955 = vmatprep.mubr.f32.mxu0 %v4614_v31  ;;  %v4303_v47 = vunpack.i.h.bf16 %v4301_v24  ;;  %v4302_v3 = vunpack.i.l.bf16 %v4301_v24  ;;  %4469 = vset.pattern.permute.xlu0 %v4615_v34  ;;  %v1798_v0 = vsel %vm577_vm1, %v1797_v41, %v4273_v40  ;;  %v3788_v52 = vcombine.low %v3749_v58, %v3781_v53 }
 0x1bb   : > { %3823 = vrot.lane.b32.xlu0 %v3784_v17, %s4608_s7  ;;  %v6986_v17 = vld [vmem:[#allocation28_spill] sm:$0xff]  ;;  %v1799_v9 = vsel %vm579_vm2, %v1798_v0, %v4283_v48  ;;  %v3653_v51 = vcombine.high %v3613_v43, %v3645_v19  ;;  %s6684_s7 = scalar_lea.hbm %s6734_s3, %s4103_s29 }
 0x1bc   : > { %3799 = vrot.lane.b32.xlu1 %v3649_v11, %s4606_s5  ;;  %v6988_v35 = vcombine.low %v6986_v17, %v6987_v50  ;;  %v4277_v17 = vunpack.i.l.bf16 %v6424_v6  ;;  %v4288_v50 = vunpack.i.h.bf16 %v6445_v57 }
 0x1bd   : > { %v4306_v42 = vpop.permute.xlu1 %4305  ;;  %v4311_v40 = vpop.permute.xlu0 %4310 }
 0x1be   : > { %v4308_v38 = vunpack.i.h.bf16 %v4306_v42  ;;  %v4307_v39 = vunpack.i.l.bf16 %v4306_v42  ;;  %v1437_v11 = vsel %vm575_vm0, %v6988_v35, %v4262_v30  ;;  %v4293_v42 = vunpack.i.h.bf16 %v4291_v33 }
 0x1bf   : > { %3827 = vrot.lane.b32.xlu0 %v3785_v44, %s4606_s5  ;;  %v4292_v44 = vunpack.i.l.bf16 %v4291_v33  ;;  %v1438_v23 = vsel %vm577_vm1, %v1437_v11, %v4272_v21  ;;  %v3652_v33 = vcombine.low %v3613_v43, %v3645_v19  ;;  %v3881_v21 = vld [vmem:[%s6733_s2] sm:$0xff]  ;;  %v6990_v43 = vld [vmem:[#allocation69_spill] sm:$0xff]  ;;  %v4287_v35 = vunpack.i.l.bf16 %v6445_v57 }
 0x1c0   : > { %v6469_v4 = vsel %vm575_vm0, %v6980_v63, %v4307_v39  ;;  %v6475_v59 = vsel %vm575_vm0, %v6983_v32, %v4308_v38  ;;  %3803 = vrot.lane.b32.xlu1 %v3650_v2, %s4609_s8  ;;  %v1439_v13 = vsel %vm579_vm2, %v1438_v23, %v4282_v55  ;;  %v1800_v16 = vsel %vm581_vm3, %v1799_v9, %v4293_v42 }
 0x1c1   : > { %v4316_v25 = vpop.permute.xlu1 %4315  ;;  %v1440_v2 = vsel %vm581_vm3, %v1439_v13, %v4292_v44  ;;  %v1801_v37 = vsel %vm583_vm4, %v1800_v16, %v4303_v47  ;;  %v4268_v55 = vunpack.i.h.bf16 %v6386_v62  ;;  %v4298_v11 = vunpack.i.h.bf16 %v6456_v7 }
 0x1c2   : > { %v4318_v38 = vunpack.i.h.bf16 %v4316_v25  ;;  %v4317_v39 = vunpack.i.l.bf16 %v4316_v25  ;;  %v1441_v63 = vsel %vm583_vm4, %v1440_v2, %v4302_v3  ;;  %v4297_v42 = vunpack.i.l.bf16 %v6456_v7 }
 0x1c3   : > { %3831 = vrot.lane.b32.xlu0 %v3786_v26, %s4609_s8  ;;  %v3789_v26 = vcombine.high %v3749_v58, %v3781_v53  ;;  %v4278_v53 = vunpack.i.h.bf16 %v6424_v6  ;;  %v4313_v41 = vunpack.i.h.bf16 %v4311_v40  ;;  %v4312_v62 = vunpack.i.l.bf16 %v4311_v40  ;;  %s3965_s8 = scalar_lea.sflag [#allocation4], %s210_s27 }
 0x1c4   : > { %3807 = vrot.lane.b32.xlu1 %v3651_v54, %s4610_s9  ;;  %v1442_v61 = vsel %vm585_vm5, %v1441_v63, %v4317_v39  ;;  %v1802_v27 = vsel %vm585_vm5, %v1801_v37, %v4318_v38  ;;  %v1431_v23 = vsel %vm577_vm1, %v6420_v18, %v4277_v17 }
 0x1c5   : > { %v6496_v22 = vpop.permute.xlu1 %4325  ;;  %v1432_v34 = vsel %vm579_vm2, %v1431_v23, %v4287_v35 }
 0x1c6   : > { %v1433_v7 = vsel %vm581_vm3, %v1432_v34, %v4297_v42 }
 0x1c7   : > { %3835 = vrot.lane.b32.xlu0 %v3787_v12, %s4610_s9  ;;  %v6989_v12 = vld [vmem:[#allocation70_spill] sm:$0xff]  ;;  %v1434_v13 = vsel %vm583_vm4, %v1433_v7, %v4312_v62  ;;  %s4616_s9 = smov [#allocation3]  }
 0x1c8   : > { %3811 = vrot.lane.b32.xlu1 %v3652_v33, %s4611_s10  ;;  %v1590_v48 = vcombine.low %v6990_v43, %v6989_v12 }
 0x1c9   : > { %v4336_v28 = vpop.permute.xlu1 %4335 }
 0x1ca   : > { %v4338_v46 = vunpack.i.h.bf16 %v4336_v28  ;;  %v4337_v32 = vunpack.i.l.bf16 %v4336_v28  ;;  %v1790_v31 = vsel %vm575_vm0, %v1590_v48, %v4268_v55 }
 0x1cb   : > { %3839 = vrot.lane.b32.xlu0 %v3788_v52, %s4611_s10  ;;  %v1791_v47 = vsel %vm577_vm1, %v1790_v31, %v4278_v53  ;;  %s4527_s10 = sshll.u32 %s4616_s9, 4  ;;  %s4528_s10 = int_to_ptr.vmem [resolvable:$false] %s4527_s10 }
 0x1cc   : > { %v1443_v30 = vsel %vm587_vm6, %v1442_v61, %v4337_v32  ;;  %v1803_v25 = vsel %vm587_vm6, %v1802_v27, %v4338_v46  ;;  %3815 = vrot.lane.b32.xlu1 %v3653_v51, %s4612_s11  ;;  %v1792_v57 = vsel %vm579_vm2, %v1791_v47, %v4288_v50  ;;  %v4328_v32 = vunpack.i.h.bf16 %v6496_v22  ;;  %p4530_p1 = scmp.lt.s32.totalorder %s6686_s4, %s4528_s10 }
 0x1cd   : > { %v4108_v29 = vpack.c.bf16 %v1803_v25, %v1443_v30  ;;  %v4346_v19 = vpop.permute.xlu1 %4345  ;;  %v1793_v38 = vsel %vm581_vm3, %v1792_v57, %v4298_v11  ;;  %v4327_v61 = vunpack.i.l.bf16 %v6496_v22 }
 0x1ce   : > { %v1794_v33 = vsel %vm583_vm4, %v1793_v38, %v4313_v41  ;;  %v4348_v51 = vunpack.i.h.bf16 %v4346_v19  ;;  %v4347_v30 = vunpack.i.l.bf16 %v4346_v19  ;;  %v2646_v12 = vsel %vm577_vm1, %v6475_v59, %v4328_v32 }
 0x1cf   : > { %3843 = vrot.lane.b32.xlu0 %v3789_v26, %s4612_s11  ;;  %4109 = vmatprep.subr.bf16.mxu0 %v4108_v29  ;;  %s4529_s11 = scalar_lea.vmem %s4528_s10, 512 }
 0x1d0   : > { %v2647_v22 = vsel %vm579_vm2, %v2646_v12, %v4348_v51  ;;  %p4531_p2 = scmp.lt.s32.totalorder %s4529_s11, %s4523_s15 }
 0x1d2   : > { %p4532_p3 = por %p4531_p2, %p4530_p1 }
 0x1d3   : > { %3884 = vperm.xlu0 %4469, %v3881_v21  }
 0x1d4   : > { %p4533_p5 = pnand %p4532_p3, %p4526_p0 }
 0x1e8   : > { %v6519_v24 = vpop.permute.xlu0 %4320  ;;  %v6524_v58 = vpop.permute.xlu1 %4355 }
 0x1e9   : > { %v4323_v34 = vunpack.i.h.bf16 %v6519_v24  ;;  %v4322_v57 = vunpack.i.l.bf16 %v6519_v24  ;;  %v4358_v32 = vunpack.i.h.bf16 %v6524_v58 }
 0x1ec   : > { %v4331_v54 = vpop.permute.xlu0 %4330  ;;  %v6540_v0 = vpop.permute.xlu1 %4365 }
 0x1ed   : > { %v4333_v6 = vunpack.i.h.bf16 %v4331_v54  ;;  %v4332_v3 = vunpack.i.l.bf16 %v4331_v54  ;;  %v2222_v54 = vsel %vm577_vm1, %v6469_v4, %v4327_v61 }
 0x1ee   : > { %v2223_v48 = vsel %vm579_vm2, %v2222_v54, %v4347_v30 }
 0x1ef   : > { %v1435_v2 = vsel %vm585_vm5, %v1434_v13, %v4332_v3  ;;  %v1795_v16 = vsel %vm585_vm5, %v1794_v33, %v4333_v6  ;;  %v6991_v13 = vld [vmem:[#allocation32_spill] sm:$0xff] }
 0x1f0   : > { %v6532_v44 = vpop.permute.xlu0 %4340 }
 0x1f1   : > { %v4343_v7 = vunpack.i.h.bf16 %v6532_v44  ;;  %v4342_v38 = vunpack.i.l.bf16 %v6532_v44  ;;  %v4357_v44 = vunpack.i.l.bf16 %v6524_v58 }
 0x1f4   : > { %v4351_v39 = vpop.permute.xlu0 %4350 }
 0x1f5   : > { %v4353_v18 = vunpack.i.h.bf16 %v4351_v39  ;;  %v4352_v9 = vunpack.i.l.bf16 %v4351_v39 }
 0x1f7   : > { %v1436_v52 = vsel %vm587_vm6, %v1435_v2, %v4352_v9  ;;  %v1796_v63 = vsel %vm587_vm6, %v1795_v16, %v4353_v18  ;;  %v6992_v18 = vld [vmem:[#allocation30_spill] sm:$0xff]  ;;  %v6994_v16 = vld [vmem:[#allocation31_spill] sm:$0xff] }
 0x1f8   : > { %v6548_v28 = vpop.permute.xlu1 %4375  ;;  %v4361_v37 = vpop.permute.xlu0 %4360  ;;  %v4110_v46 = vpack.c.bf16 %v1796_v63, %v1436_v52  ;;  %v6993_v9 = vcombine.low %v6991_v13, %v6992_v18  ;;  %v6995_v52 = vld [vmem:[#allocation27_spill] sm:$0xff] }
 0x1f9   : > { %v4363_v26 = vunpack.i.h.bf16 %v4361_v37  ;;  %v4362_v29 = vunpack.i.l.bf16 %v4361_v37  ;;  %v6996_v63 = vcombine.low %v6994_v16, %v6995_v52 }
 0x1fa   : > { %4111 = vmatpush1.bf16.msra.mxu0 %v4110_v46  ;;  %v2638_v2 = vsel %vm575_vm0, %v6993_v9, %v4323_v34  ;;  %v4378_v34 = vunpack.i.h.bf16 %v6548_v28 }
 0x1fb   : > { %v2648_v55 = vsel %vm581_vm3, %v2647_v22, %v4363_v26  ;;  %v2224_v19 = vsel %vm581_vm3, %v2223_v48, %v4362_v29  ;;  %v2214_v37 = vsel %vm575_vm0, %v6996_v63, %v4322_v57  ;;  %v2639_v46 = vsel %vm577_vm1, %v2638_v2, %v4343_v7 }
 0x1fc   : > { %v4386_v27 = vpop.permute.xlu1 %4385  ;;  %v4371_v25 = vpop.permute.xlu0 %4370  ;;  %v2215_v24 = vsel %vm577_vm1, %v2214_v37, %v4342_v38  ;;  %v2640_v30 = vsel %vm579_vm2, %v2639_v46, %v4358_v32  ;;  %v4368_v29 = vunpack.i.h.bf16 %v6540_v0  ;;  %v4377_v57 = vunpack.i.l.bf16 %v6548_v28  ;;  %v6999_v28 = vld [vmem:[#allocation36_spill] sm:$0xff] }
 0x1fd   : > { %v4373_v21 = vunpack.i.h.bf16 %v4371_v25  ;;  %v4372_v40 = vunpack.i.l.bf16 %v4371_v25  ;;  %v4388_v53 = vunpack.i.h.bf16 %v4386_v27  ;;  %v4387_v17 = vunpack.i.l.bf16 %v4386_v27 }
 0x1fe   : > { %v2216_v51 = vsel %vm579_vm2, %v2215_v24, %v4357_v44  ;;  %v2641_v48 = vsel %vm581_vm3, %v2640_v30, %v4368_v29  ;;  %v7000_v2 = vcombine.low %v6083_v56, %v6999_v28 }
 0x1ff   : > { %v2225_v50 = vsel %vm583_vm4, %v2224_v19, %v4372_v40  ;;  %v2649_v35 = vsel %vm583_vm4, %v2648_v55, %v4373_v21  ;;  %v4367_v21 = vunpack.i.l.bf16 %v6540_v0 }
 0x200   : > { %v6558_v43 = vpop.permute.xlu1 %4395  ;;  %v2226_v31 = vsel %vm585_vm5, %v2225_v50, %v4387_v17  ;;  %v2650_v41 = vsel %vm585_vm5, %v2649_v35, %v4388_v53  ;;  %v3429_v16 = vsel %vm575_vm0, %v7000_v2, %v4378_v34 }
 0x201   : > { %v4381_v11 = vpop.permute.xlu0 %4380  ;;  %v2217_v12 = vsel %vm581_vm3, %v2216_v51, %v4367_v21  ;;  %v4397_v13 = vunpack.i.l.bf16 %v6558_v43 }
 0x202   : > { %v4383_v25 = vunpack.i.h.bf16 %v4381_v11  ;;  %v4382_v26 = vunpack.i.l.bf16 %v4381_v11 }
 0x204   : > { %v4406_v4 = vpop.permute.xlu1 %4405  ;;  %v2218_v22 = vsel %vm583_vm4, %v2217_v12, %v4382_v26  ;;  %v2642_v55 = vsel %vm583_vm4, %v2641_v48, %v4383_v25 }
 0x205   : > { %v4408_v42 = vunpack.i.h.bf16 %v4406_v4  ;;  %v4407_v59 = vunpack.i.l.bf16 %v4406_v4 }
 0x207   : > { %v2227_v62 = vsel %vm587_vm6, %v2226_v31, %v4407_v59  ;;  %v2651_v23 = vsel %vm587_vm6, %v2650_v41, %v4408_v42  ;;  %v6997_v59 = vld [vmem:[#allocation35_spill] sm:$0xff]  ;;  %v6998_v31 = vld [vmem:[#allocation34_spill] sm:$0xff] }
 0x208   : > { %v4112_v6 = vpack.c.bf16 %v2651_v23, %v2227_v62  ;;  %v4391_v3 = vpop.permute.xlu0 %4390  ;;  %v2934_v41 = vcombine.low %v6998_v31, %v6997_v59  ;;  %v2798_v62 = vcombine.low %v6136_v45, %v6139_v36 }
 0x209   : > { %v6570_v47 = vpop.permute.xlu1 %4415  ;;  %v4393_v23 = vunpack.i.h.bf16 %v4391_v3 }
 0x20a   : > { %4113 = vmatprep.subr.bf16.mxu0 %v4112_v6  ;;  %v4392_v6 = vunpack.i.l.bf16 %v4391_v3  ;;  %v3005_v3 = vsel %vm575_vm0, %v2934_v41, %v4377_v57  ;;  %v4418_v63 = vunpack.i.h.bf16 %v6570_v47  ;;  %v4417_v37 = vunpack.i.l.bf16 %v6570_v47 }
 0x20b   : > { %v3422_v45 = vsel %vm575_vm0, %v3222_v49, %v4393_v23  ;;  %v3006_v49 = vsel %vm577_vm1, %v3005_v3, %v4397_v13 }
 0x20c   : > { %v2998_v36 = vsel %vm575_vm0, %v2798_v62, %v4392_v6  ;;  %v3007_v21 = vsel %vm579_vm2, %v3006_v49, %v4417_v37 }
 0x20d   : > { %v6576_v39 = vpop.permute.xlu1 %4425  ;;  %v4401_v33 = vpop.permute.xlu0 %4400 }
 0x20e   : > { %v4403_v40 = vunpack.i.h.bf16 %v4401_v33  ;;  %v4402_v54 = vunpack.i.l.bf16 %v4401_v33  ;;  %v4398_v33 = vunpack.i.h.bf16 %v6558_v43  ;;  %v4428_v60 = vunpack.i.h.bf16 %v6576_v39 }
 0x20f   : > { %v4427_v8 = vunpack.i.l.bf16 %v6576_v39 }
 0x210   : > { %v2219_v17 = vsel %vm585_vm5, %v2218_v22, %v4402_v54  ;;  %v2643_v50 = vsel %vm585_vm5, %v2642_v55, %v4403_v40  ;;  %v3430_v24 = vsel %vm577_vm1, %v3429_v16, %v4398_v33 }
 0x211   : > { %v6590_v61 = vpop.permute.xlu1 %4435  ;;  %v4411_v27 = vpop.permute.xlu0 %4410  ;;  %v3431_v40 = vsel %vm579_vm2, %v3430_v24, %v4418_v63 }
 0x212   : > { %v4413_v7 = vunpack.i.h.bf16 %v4411_v27  ;;  %v4412_v38 = vunpack.i.l.bf16 %v4411_v27  ;;  %v4438_v25 = vunpack.i.h.bf16 %v6590_v61  ;;  %v4437_v47 = vunpack.i.l.bf16 %v6590_v61 }
 0x214   : > { %v2999_v52 = vsel %vm577_vm1, %v2998_v36, %v4412_v38  ;;  %v3423_v43 = vsel %vm577_vm1, %v3422_v45, %v4413_v7 }
 0x215   : > { %v4421_v58 = vpop.permute.xlu0 %4420  ;;  %v6602_v35 = vpop.permute.xlu1 %4445  ;;  %v3000_v44 = vsel %vm579_vm2, %v2999_v52, %v4427_v8  ;;  %v3424_v27 = vsel %vm579_vm2, %v3423_v43, %v4428_v60 }
 0x216   : > { %v4423_v19 = vunpack.i.h.bf16 %v4421_v58  ;;  %v4422_v53 = vunpack.i.l.bf16 %v4421_v58  ;;  %v4448_v54 = vunpack.i.h.bf16 %v6602_v35  ;;  %v4447_v12 = vunpack.i.l.bf16 %v6602_v35 }
 0x217   : > { %v3001_v48 = vsel %vm581_vm3, %v3000_v44, %v4437_v47  ;;  %v3425_v58 = vsel %vm581_vm3, %v3424_v27, %v4438_v25  ;;  %v3862_v27 = vld [vmem:[%s6732_s1] sm:$0xff] }
 0x218   : > { %v2220_v0 = vsel %vm587_vm6, %v2219_v17, %v4422_v53  ;;  %v2644_v4 = vsel %vm587_vm6, %v2643_v50, %v4423_v19  ;;  %v3002_v23 = vsel %vm583_vm4, %v3001_v48, %v4447_v12  ;;  %v3426_v6 = vsel %vm583_vm4, %v3425_v58, %v4448_v54 }
 0x219   : > { %v4431_v11 = vpop.permute.xlu0 %4430  ;;  %v4114_v42 = vpack.c.bf16 %v2644_v4, %v2220_v0  ;;  %v4456_v18 = vpop.permute.xlu1 %4455 }
 0x21a   : > { %v4433_v46 = vunpack.i.h.bf16 %v4431_v11  ;;  %v4432_v56 = vunpack.i.l.bf16 %v4431_v11  ;;  %v4458_v0 = vunpack.i.h.bf16 %v4456_v18  ;;  %v4457_v4 = vunpack.i.l.bf16 %v4456_v18 }
 0x21b   : > { %4115 = vmatpush1.bf16.msra.mxu0 %v4114_v42 }
 0x21c   : > { %v3432_v22 = vsel %vm581_vm3, %v3431_v40, %v4433_v46  ;;  %v3008_v55 = vsel %vm581_vm3, %v3007_v21, %v4432_v56  ;;  %v3003_v7 = vsel %vm585_vm5, %v3002_v23, %v4457_v4  ;;  %v3427_v38 = vsel %vm585_vm5, %v3426_v6, %v4458_v0 }
 0x21d   : > { %v4441_v9 = vpop.permute.xlu0 %4440  ;;  %v3820_v26 = vpop.permute.xlu1 %3819 }
 0x21e   : > { %v4443_v51 = vunpack.i.h.bf16 %v4441_v9  ;;  %v4442_v30 = vunpack.i.l.bf16 %v4441_v9  ;;  %v3853_v63 = vsel %vm575_vm0, %v3782_v5, %v3820_v26 }
 0x220   : > { %v3009_v19 = vsel %vm583_vm4, %v3008_v55, %v4442_v30  ;;  %v3433_v53 = vsel %vm583_vm4, %v3432_v22, %v4443_v51 }
 0x221   : > { %v4451_v32 = vpop.permute.xlu0 %4450 }
 0x222   : > { %v4453_v29 = vunpack.i.h.bf16 %v4451_v32  ;;  %v4452_v39 = vunpack.i.l.bf16 %v4451_v32 }
 0x224   : > { %v3010_v11 = vsel %vm585_vm5, %v3009_v19, %v4452_v39  ;;  %v3434_v35 = vsel %vm585_vm5, %v3433_v53, %v4453_v29 }
 0x225   : > { %v4461_v61 = vpop.permute.xlu0 %4460 }
 0x226   : > { %v4463_v17 = vunpack.i.h.bf16 %v4461_v61  ;;  %v4462_v50 = vunpack.i.l.bf16 %v4461_v61  ;;  %v3792_v42 = vpop.permute.xlu1 %3791 }
 0x227   : > { %v3846_v37 = vsel %vm575_vm0, %v3646_v10, %v3792_v42 }
 0x228   : > { %v3011_v59 = vsel %vm587_vm6, %v3010_v11, %v4462_v50  ;;  %v3435_v31 = vsel %vm587_vm6, %v3434_v35, %v4463_v17 }
 0x229   : > { %v4466_v41 = vpop.permute.xlu0 %4465  ;;  %v4116_v62 = vpack.c.bf16 %v3435_v31, %v3011_v59 }
 0x22a   : > { %v4468_v34 = vunpack.i.h.bf16 %v4466_v41  ;;  %v4467_v57 = vunpack.i.l.bf16 %v4466_v41  ;;  %v3796_v33 = vpop.permute.xlu1 %3795 }
 0x22b   : > { %4117 = vmatprep.subr.bf16.mxu0 %v4116_v62  ;;  %v3847_v49 = vsel %vm577_vm1, %v3846_v37, %v3796_v33 }
 0x22c   : > { %v3004_v13 = vsel %vm587_vm6, %v3003_v7, %v4467_v57  ;;  %v3428_v18 = vsel %vm587_vm6, %v3427_v38, %v4468_v34 }
 0x22d   : > { %v3824_v9 = vpop.permute.xlu0 %3823  ;;  %v4118_v45 = vpack.c.bf16 %v3428_v18, %v3004_v13 }
 0x22e   : > { %v3800_v36 = vpop.permute.xlu1 %3799  ;;  %v3854_v60 = vsel %vm577_vm1, %v3853_v63, %v3824_v9 }
 0x22f   : > { %4119 = vmatpush1.bf16.msra.mxu0 %v4118_v45  ;;  %v3848_v46 = vsel %vm579_vm2, %v3847_v49, %v3800_v36 }
 0x231   : > { %v3828_v3 = vpop.permute.xlu0 %3827 }
 0x232   : > { %v3804_v28 = vpop.permute.xlu1 %3803  ;;  %v3855_v24 = vsel %vm579_vm2, %v3854_v60, %v3828_v3 }
 0x233   : > { %v3849_v1 = vsel %vm581_vm3, %v3848_v46, %v3804_v28 }
 0x235   : > { %v3832_v2 = vpop.permute.xlu0 %3831 }
 0x236   : > { %v3808_v16 = vpop.permute.xlu1 %3807  ;;  %v3856_v56 = vsel %vm581_vm3, %v3855_v24, %v3832_v2 }
 0x237   : > { %v3850_v14 = vsel %vm583_vm4, %v3849_v1, %v3808_v16 }
 0x239   : > { %v3836_v52 = vpop.permute.xlu0 %3835 }
 0x23a   : > { %v3812_v43 = vpop.permute.xlu1 %3811  ;;  %v3857_v15 = vsel %vm583_vm4, %v3856_v56, %v3836_v52 }
 0x23b   : > { %v3851_v32 = vsel %vm585_vm5, %v3850_v14, %v3812_v43 }
 0x23d   : > { %v3840_v8 = vpop.permute.xlu0 %3839 }
 0x23e   : > { %v3816_v5 = vpop.permute.xlu1 %3815  ;;  %v3858_v20 = vsel %vm585_vm5, %v3857_v15, %v3840_v8 }
 0x23f   : > { %v3852_v51 = vsel %vm587_vm6, %v3851_v32, %v3816_v5 }
 0x241   : > { %v3844_v10 = vpop.permute.xlu0 %3843 }
 0x242   : > { %v3859_v44 = vsel %vm587_vm6, %v3858_v20, %v3844_v10 }
 0x243   : > { %3907 = vmatprep.subr.mxu0 %v3859_v44 }
 0x244   : > { %3908 = vmatpush1.msra.mxu0 %v3852_v51 }
 0x245   : > { %4097 = vmatmul.mubr.msk.f32.vlgmr.msra.gmra.mrb[0].mxu0 %vm3887_vm7, %v3862_v27 }
 0x252   : > { %v3885_v30 = vpop.permute.xlu0 %3884 }
 0x318   : > { %v3957_v25 = vpop.f32.mrb[0].mxu0 }
 0x319   : > { %v3958_v47 = vadd.f32 %v3957_v25, %v3885_v30  ;;  %v3959_v26 = vpop.f32.mrb[1].mxu0 }
 0x31a   : > { %v3960_v29 = vadd.f32 %v3959_v26, %v3885_v30 }
 0x31b   : > { %3962 = vst [vmem:[%s212_s30] sm:$0xff] %v3958_v47 }
 0x31c   : > { %3963 = vst [vmem:[%s212_s30 + $0x8] sm:$0xff] %v3960_v29 }
 0x31d   : > { %4536 = shalt.err (!%p4533_p5)
}
 0x31e   : > { %s4537_s18 = scalar_lea.hbm %s6684_s7, 256  ;;  %s4541_s23 = scalar_lea.hbm %s6734_s3, 512 }
 0x31f   : > { %p4538_p6 = scmp.ne.s32.totalorder %s6684_s7, %s4537_s18  ;;  %p4542_p10 = scmp.lt.u32.totalorder %s6684_s7, %s6734_s3 }
 0x320   : > { %p4543_p11 = scmp.lt.u32.totalorder %s4541_s23, %s4537_s18  ;;  %p4545_p13 = scmp.lt.u32.totalorder %s4537_s18, %s6684_s7 }
 0x321   : > { %p4539_p7 = pnand %p4538_p6, %p4677_p4 }
 0x322   : > { %p4544_p12 = por %p4543_p11, %p4542_p10 }
 0x323   : > { %p4540_p9 = pneg %p4539_p7 }
 0x324   : > { %p4546_p0 = por %p4545_p13, %p4544_p12 }
 0x326   : > { %p4547_p1 = pnand %p4546_p0, %p4540_p9 }
 0x328   : > { %4550 = shalt.err (!%p4547_p1)
}
 0x329   : > { %4121 = dma.vmem_to_hbm [thread:$0]  (%p4677_p4), %s6686_s4, 256, %s6684_s7, %s3965_s8  }
 0x32a PF: > { %p4127_p2 = scmp.ge.s32.totalorder %s4601_s17, 2  ;;  %s3995_s28 = sand.u32 1, %s4581_s12  }
 0x32b   : > { %s3996_s29 = scalar_lea.sflag [#allocation4], %s3995_s28 }
 0x32c   : > { %p4124_p3 = pnand %p4127_p2, %p4684_p8 }
 0x32e   : > { %4576 = dma.done.wait (!%p4124_p3), %s3996_s29, 256  }
 0x32f   : > { %4578 = vsyncadd (!%p4124_p3), %s3996_s29, 4294967040  ;;  %s16_s17 = sadd.s32 1, %s4601_s17   ;;  %s7001_s12 = smov %s4585_s13 }
 0x330   : > { %p13_p5 = scmp.ge.s32.totalorder %s16_s17, 4   ;;  %s7002_s13 = smov %s4589_s14 }
 0x331   : > { %s7003_s14 = smov %s4690_s25  ;;  %s7004_s15 = smov %s4597_s16 }
 0x332   : > { %s7005_s16 = smov %s7007_s20  ;;  %15 = sbr.rel (!%p13_p5) target bundleno = 4 (0x4), region = 77 }
 0x339   :  { %4001 = vsyncpa [#allocation4], 1 }
 0x33a   :  { %4003 = vsyncpa [#allocation4 + $0x1], 1 }

</bundles_post_ra>
